<compile_context>
chip_gen: v7x
topology: tpu7x:2x2x1
jax: 0.10.0
libtpu: 0.0.40
codegen_flags: <defaults>
</compile_context>

<pallas_src>
import functools
import math

import jax
import jax.numpy as jnp
from jax import lax
from jax.experimental import pallas as pl
from jax.experimental.pallas import tpu as pltpu


_APPROX_GELU = False  # True -> jax.nn.gelu(approximate=True): EUP tanh, slight
                      # deviation from PyTorch nn.GELU(approximate='none')


def _gelu(v):
    if _APPROX_GELU:
        return jax.nn.gelu(v, approximate=True)
    # exact (erf) GELU, matching PyTorch nn.GELU(approximate='none')
    return 0.5 * v * (1.0 + lax.erf(v * (1.0 / math.sqrt(2.0))))


def _round_up(x, m):
    return (x + m - 1) // m * m


def _bf16(v):
    return v.astype(jnp.bfloat16)


# ----------------------------------------------------------------------------
# Kernel 1: coor_encoder + global_feature MLPs on one tile of points; emits the
# per-tile max of the global feature (parallel over tiles, no accumulator).
# Garbage rows of a partial last tile are masked to -inf before the max.
# ----------------------------------------------------------------------------
def _global_max_kernel(x_ref,
                       w1_ref, b1_ref, w2_ref, b2_ref, w3_ref, b3_ref,
                       gw1_ref, gb1_ref, gw2_ref, gb2_ref, gw3_ref, gb3_ref,
                       pmax_ref, *, n_total, tile_n):
    x = x_ref[...]                                                     # (tn, Cin)

    # coor_encoder: Linear -> GELU -> Linear -> GELU -> Linear  (bf16 matmuls,
    # f32 accumulate / bias / GELU)
    h = _gelu(jnp.dot(_bf16(x), w1_ref[...],
                      preferred_element_type=jnp.float32) + b1_ref[...])
    h = _gelu(jnp.dot(_bf16(h), w2_ref[...],
                      preferred_element_type=jnp.float32) + b2_ref[...])
    xe = (jnp.dot(_bf16(h), w3_ref[...],
                  preferred_element_type=jnp.float32) + b3_ref[...])   # (tn, Hp)

    # global_feature: Linear -> GELU -> Linear -> GELU -> Linear(H -> 2H)
    g = _gelu(jnp.dot(_bf16(xe), gw1_ref[...],
                      preferred_element_type=jnp.float32) + gb1_ref[...])
    g = _gelu(jnp.dot(_bf16(g), gw2_ref[...],
                      preferred_element_type=jnp.float32) + gb2_ref[...])
    g = (jnp.dot(_bf16(g), gw3_ref[...],
                 preferred_element_type=jnp.float32) + gb3_ref[...])   # (tn, 2Hp)

    if n_total % tile_n:
        # last grid step has a partial block: mask out-of-bounds rows so they
        # cannot win the max (rows are independent, so garbage stays local).
        row = (pl.program_id(0) * tile_n
               + lax.broadcasted_iota(jnp.int32, g.shape, 0))
        g = jnp.where(row < n_total, g, -jnp.inf)

    pmax_ref[...] = jnp.max(g, axis=0, keepdims=True)[None]            # (1,1,2Hp)


# ----------------------------------------------------------------------------
# Kernel 2: recompute encoder from the raw x tile (avoids an x_enc HBM round
# trip), then decoder MLP with the grid-invariant global-feature term
# pre-folded into the first decoder bias (dbias = db1 + g_max @ dw1[H:,:]).
# The final store writes only the true out_ch lanes (no 32x write
# amplification when out_ch is tiny).
# ----------------------------------------------------------------------------
def _decoder_kernel(x_ref,
                    w1_ref, b1_ref, w2_ref, b2_ref, w3_ref, b3_ref,
                    dw1t_ref, dbias_ref, dw2_ref, db2_ref, dw3_ref, db3_ref,
                    out_ref, *, out_ch):
    x = x_ref[...]                                                     # (tn, Cin)

    # coor_encoder (recompute: 3 small matmuls, cheaper than an HBM round trip)
    h = _gelu(jnp.dot(_bf16(x), w1_ref[...],
                      preferred_element_type=jnp.float32) + b1_ref[...])
    h = _gelu(jnp.dot(_bf16(h), w2_ref[...],
                      preferred_element_type=jnp.float32) + b2_ref[...])
    xe = (jnp.dot(_bf16(h), w3_ref[...],
                  preferred_element_type=jnp.float32) + b3_ref[...])   # (tn, Hp)

    # decoder: concat([xe, g]) @ W1 == xe @ W1[:H] + (g @ W1[H:] + b1) [hoisted]
    h1 = _gelu(jnp.dot(_bf16(xe), dw1t_ref[...],
                       preferred_element_type=jnp.float32) + dbias_ref[...])
    h2 = _gelu(jnp.dot(_bf16(h1), dw2_ref[...],
                       preferred_element_type=jnp.float32) + db2_ref[...])
    y = (jnp.dot(_bf16(h2), dw3_ref[...],
                 preferred_element_type=jnp.float32) + db3_ref[...])   # (tn, Op)
    out_ref[...] = jax.nn.sigmoid(y[:, :out_ch])                       # (tn, out_ch)


# ----------------------------------------------------------------------------
# Parameter padding: hidden dims padded to multiples of 128 so every matmul
# operand is lane-dense; matmul weights cast to bf16 (biases stay f32).
# Padded units carry zero weights/bias, so they stay exactly zero through GELU
# and contribute nothing downstream.
# ----------------------------------------------------------------------------
def _pad2(a, rows, cols):
    r, c = a.shape
    return jnp.pad(a, ((0, rows - r), (0, cols - c)))


def _prepare_padded_params(p, lane=128):
    cin, hid = p["w1"].shape
    out_ch = p["dw3"].shape[1]
    hp = _round_up(hid, lane)
    op = _round_up(out_ch, lane)   # padded only for the in-kernel matmul;
                                   # the HBM output stays out_ch wide
    bf = jnp.bfloat16

    q = {}
    # coor_encoder
    q["w1"] = _pad2(p["w1"], cin, hp).astype(bf); q["b1"] = _pad2(p["b1"], 1, hp)
    q["w2"] = _pad2(p["w2"], hp, hp).astype(bf);  q["b2"] = _pad2(p["b2"], 1, hp)
    q["w3"] = _pad2(p["w3"], hp, hp).astype(bf);  q["b3"] = _pad2(p["b3"], 1, hp)
    # global_feature
    q["gw1"] = _pad2(p["gw1"], hp, hp).astype(bf);      q["gb1"] = _pad2(p["gb1"], 1, hp)
    q["gw2"] = _pad2(p["gw2"], hp, hp).astype(bf);      q["gb2"] = _pad2(p["gb2"], 1, hp)
    q["gw3"] = _pad2(p["gw3"], hp, 2 * hp).astype(bf);  q["gb3"] = _pad2(p["gb3"], 1, 2 * hp)
    # decoder: split first weight into the xe part and the global-feature part
    dw1 = p["dw1"]                                        # (3H, H)
    q["dw1_top"] = _pad2(dw1[:hid, :], hp, hp).astype(bf)  # xe @ dw1_top (in kernel)
    q["dw1_bot"] = _pad2(dw1[hid:, :], 2 * hp, hp)          # g_max @ dw1_bot (JAX glue, f32)
    q["db1"] = _pad2(p["db1"], 1, hp)
    q["dw2"] = _pad2(p["dw2"], hp, hp).astype(bf); q["db2"] = _pad2(p["db2"], 1, hp)
    q["dw3"] = _pad2(p["dw3"], hp, op).astype(bf); q["db3"] = _pad2(p["db3"], 1, op)
    return q, hp, op, out_ch


def _const_spec(arr):
    # Grid-invariant whole-array block.  Single-buffered: the index_map never
    # changes, so double-buffering would only burn VMEM (halves weight VMEM).
    return pl.BlockSpec(arr.shape, lambda i: (0,) * arr.ndim,
                        pipeline_mode=pl.Buffered(1))


# ----------------------------------------------------------------------------
# Wrapper
# ----------------------------------------------------------------------------
@functools.partial(jax.jit, static_argnames=("tile_n",))
def pointnet_forward(x, params, tile_n=1024):
    """x: (N, in_channels) float32 point cloud.  Returns (N, out_channels) f32."""
    n, cin = x.shape
    q, hp, op, out_ch = _prepare_padded_params(params)

    # Tile sizing: multiple of 8; big enough to amortize the ~0.35 us per-step
    # overhead and the weight re-streaming into the MXU; clamped so the grid
    # has >= 2 steps (keeps both v7x TensorCores busy with "parallel").
    # No explicit x padding: partial last block handled by masking (pass 1)
    # and clipped output writeback (pass 2).
    tile_n = max(8, tile_n - tile_n % 8)
    tile_n = min(tile_n, _round_up(pl.cdiv(n, 2), 8))
    n_tiles = pl.cdiv(n, tile_n)
    grid = (n_tiles,)

    # 48 MiB: above the 32 MiB scoped default, below v7x's 64 MiB physical.
    # Weights are bf16 + single-buffered, so even tile_n=1024 / H=512 fits
    # comfortably; sweep tile_n 512..2048 on v5e/v6e, about half that on v7x.
    cparams = pltpu.CompilerParams(
        dimension_semantics=("parallel",),
        vmem_limit_bytes=48 * 1024 * 1024)

    # ---- pass 1: per-tile partial max of the global feature -----------------
    enc_names = ["w1", "b1", "w2", "b2", "w3", "b3",
                 "gw1", "gb1", "gw2", "gb2", "gw3", "gb3"]
    enc_w = [q[k] for k in enc_names]

    flops1 = 2 * n * (cin * hp + 6 * hp * hp)
    trans1 = n * 4 * hp
    bytes1 = (4 * n * cin + 4 * n_tiles * 2 * hp
              + sum(int(w.size) * w.dtype.itemsize for w in enc_w))

    kernel1 = functools.partial(_global_max_kernel, n_total=n, tile_n=tile_n)
    partial_max = pl.pallas_call(
        kernel1,
        out_shape=jax.ShapeDtypeStruct((n_tiles, 1, 2 * hp), jnp.float32),
        grid_spec=pltpu.PrefetchScalarGridSpec(
            num_scalar_prefetch=0,
            grid=grid,
            in_specs=[pl.BlockSpec((tile_n, cin), lambda i: (i, 0))]
                     + [_const_spec(w) for w in enc_w],
            out_specs=pl.BlockSpec((1, 1, 2 * hp), lambda i: (i, 0, 0)),
        ),
        compiler_params=cparams,
        cost_estimate=pl.CostEstimate(
            flops=flops1, transcendentals=trans1, bytes_accessed=bytes1),
    )(x, *enc_w)

    # ---- tiny glue in plain JAX: combine partial maxes, hoist g_max term ----
    g_max = jnp.max(partial_max[:, 0, :], axis=0, keepdims=True)       # (1, 2Hp)
    dec_bias = q["db1"] + jnp.dot(g_max, q["dw1_bot"],
                                  preferred_element_type=jnp.float32)  # (1, Hp)

    # ---- pass 2: encoder recompute + decoder --------------------------------
    dec_w = [q["w1"], q["b1"], q["w2"], q["b2"], q["w3"], q["b3"],
             q["dw1_top"], dec_bias, q["dw2"], q["db2"], q["dw3"], q["db3"]]

    flops2 = 2 * n * (cin * hp + 4 * hp * hp + hp * op)
    trans2 = n * (4 * hp + out_ch)
    bytes2 = (4 * n * cin + 4 * n * out_ch
              + sum(int(w.size) * w.dtype.itemsize for w in dec_w))

    kernel2 = functools.partial(_decoder_kernel, out_ch=out_ch)
    out = pl.pallas_call(
        kernel2,
        out_shape=jax.ShapeDtypeStruct((n, out_ch), jnp.float32),
        grid_spec=pltpu.PrefetchScalarGridSpec(
            num_scalar_prefetch=0,
            grid=grid,
            in_specs=[pl.BlockSpec((tile_n, cin), lambda i: (i, 0))]
                     + [_const_spec(w) for w in dec_w],
            out_specs=pl.BlockSpec((tile_n, out_ch), lambda i: (i, 0)),
        ),
        compiler_params=cparams,
        cost_estimate=pl.CostEstimate(
            flops=flops2, transcendentals=trans2, bytes_accessed=bytes2),
    )(x, *dec_w)

    return out


# ----------------------------------------------------------------------------
# Deterministic parameter init (synthetic; shapes follow PointNet.__init__)
# ----------------------------------------------------------------------------
def init_params(key, in_channels, hidden, out_channels):
    def lin(k, fan_in, fan_out):
        kw, kb = jax.random.split(k)
        w = jax.random.normal(kw, (fan_in, fan_out), jnp.float32) * 0.1
        b = jax.random.normal(kb, (1, fan_out), jnp.float32) * 0.1
        return w, b

    keys = jax.random.split(key, 9)
    p = {}
    # coor_encoder
    p["w1"], p["b1"] = lin(keys[0], in_channels, hidden)
    p["w2"], p["b2"] = lin(keys[1], hidden, hidden)
    p["w3"], p["b3"] = lin(keys[2], hidden, hidden)
    # global_feature
    p["gw1"], p["gb1"] = lin(keys[3], hidden, hidden)
    p["gw2"], p["gb2"] = lin(keys[4], hidden, hidden)
    p["gw3"], p["gb3"] = lin(keys[5], hidden, 2 * hidden)
    # decoder
    p["dw1"], p["db1"] = lin(keys[6], 3 * hidden, hidden)
    p["dw2"], p["db2"] = lin(keys[7], hidden, hidden)
    p["dw3"], p["db3"] = lin(keys[8], hidden, out_channels)
    return p


def _reference(x, p):
    # pure-JAX f32 reference mirroring the PyTorch forward
    h = _gelu(x @ p["w1"] + p["b1"])
    h = _gelu(h @ p["w2"] + p["b2"])
    xe = h @ p["w3"] + p["b3"]
    g = _gelu(xe @ p["gw1"] + p["gb1"])
    g = _gelu(g @ p["gw2"] + p["gb2"])
    g = g @ p["gw3"] + p["gb3"]
    gmax = jnp.max(g, axis=0, keepdims=True)
    xg = jnp.concatenate(
        [xe, jnp.broadcast_to(gmax, (xe.shape[0], gmax.shape[1]))], -1)
    d = _gelu(xg @ p["dw1"] + p["db1"])
    d = _gelu(d @ p["dw2"] + p["db2"])
    return jax.nn.sigmoid(d @ p["dw3"] + p["db3"])


if __name__ == "__main__":
    key = jax.random.PRNGKey(0)
    k_x, k_p = jax.random.split(key)

    # N=20 deliberately not a multiple of the clamped tile (16): exercises the
    # partial-block mask in pass 1 and the clipped output writeback in pass 2.
    N, IN_CH, HID, OUT_CH = 20, 4, 32, 4
    x = jax.random.normal(k_x, (N, IN_CH), jnp.float32)
    params = init_params(k_p, IN_CH, HID, OUT_CH)
    # TODO(synk): optional `graph.param` concat is plain-JAX glue — concatenate
    # onto x before calling pointnet_forward; not exercised here.

    out = pointnet_forward(x, params)          # tile_n auto-clamped for small N
    out = jax.block_until_ready(out)

    ref = _reference(x, params)
    assert out.shape == (N, OUT_CH)
    err = float(jnp.max(jnp.abs(out - ref)))
    # bf16 MXU operands -> tolerance looser than the pure-f32 check
    assert err < 2e-2, f"mismatch vs reference: max abs err {err}"
    print("KERNEL_OK")
</pallas_src>

<mosaic_0001>
module attributes {stable_mosaic.version = 11 : i64} {
  func.func @_global_max_kernel(%arg0: i32, %arg1: memref<16x4xf32, #tpu.memory_space<vmem>>, %arg2: memref<4x128xbf16, #tpu.memory_space<vmem>>, %arg3: memref<1x128xf32, #tpu.memory_space<vmem>>, %arg4: memref<128x128xbf16, #tpu.memory_space<vmem>>, %arg5: memref<1x128xf32, #tpu.memory_space<vmem>>, %arg6: memref<128x128xbf16, #tpu.memory_space<vmem>>, %arg7: memref<1x128xf32, #tpu.memory_space<vmem>>, %arg8: memref<128x128xbf16, #tpu.memory_space<vmem>>, %arg9: memref<1x128xf32, #tpu.memory_space<vmem>>, %arg10: memref<128x128xbf16, #tpu.memory_space<vmem>>, %arg11: memref<1x128xf32, #tpu.memory_space<vmem>>, %arg12: memref<128x256xbf16, #tpu.memory_space<vmem>>, %arg13: memref<1x256xf32, #tpu.memory_space<vmem>>, %arg14: memref<1x1x256xf32, #tpu.memory_space<vmem>>) attributes {dimension_semantics = [#tpu.dimension_semantics<parallel>], iteration_bounds = array<i64: 2>, scalar_prefetch = 0 : i64, scratch_operands = 0 : i64, tpu.core_type = #tpu.core_type<tc>, window_params = [{transform_indices = @transform_0, window_bounds = array<i64: 16, 4>}, {pipeline_mode = #tpu.pipeline_mode<synchronous>, transform_indices = @transform_1, window_bounds = array<i64: 4, 128>}, {pipeline_mode = #tpu.pipeline_mode<synchronous>, transform_indices = @transform_2, window_bounds = array<i64: 1, 128>}, {pipeline_mode = #tpu.pipeline_mode<synchronous>, transform_indices = @transform_3, window_bounds = array<i64: 128, 128>}, {pipeline_mode = #tpu.pipeline_mode<synchronous>, transform_indices = @transform_4, window_bounds = array<i64: 1, 128>}, {pipeline_mode = #tpu.pipeline_mode<synchronous>, transform_indices = @transform_5, window_bounds = array<i64: 128, 128>}, {pipeline_mode = #tpu.pipeline_mode<synchronous>, transform_indices = @transform_6, window_bounds = array<i64: 1, 128>}, {pipeline_mode = #tpu.pipeline_mode<synchronous>, transform_indices = @transform_7, window_bounds = array<i64: 128, 128>}, {pipeline_mode = #tpu.pipeline_mode<synchronous>, transform_indices = @transform_8, window_bounds = array<i64: 1, 128>}, {pipeline_mode = #tpu.pipeline_mode<synchronous>, transform_indices = @transform_9, window_bounds = array<i64: 128, 128>}, {pipeline_mode = #tpu.pipeline_mode<synchronous>, transform_indices = @transform_10, window_bounds = array<i64: 1, 128>}, {pipeline_mode = #tpu.pipeline_mode<synchronous>, transform_indices = @transform_11, window_bounds = array<i64: 128, 256>}, {pipeline_mode = #tpu.pipeline_mode<synchronous>, transform_indices = @transform_12, window_bounds = array<i64: 1, 256>}, {transform_indices = @transform_13, window_bounds = array<i64: 1, 1, 256>}]} {
    %c0 = arith.constant 0 : index
    %c0_0 = arith.constant 0 : index
    %0 = vector.load %arg1[%c0, %c0_0] : memref<16x4xf32, #tpu.memory_space<vmem>>, vector<16x4xf32>
    %1 = arith.truncf %0 : vector<16x4xf32> to vector<16x4xbf16>
    %c0_1 = arith.constant 0 : index
    %c0_2 = arith.constant 0 : index
    %2 = vector.load %arg2[%c0_1, %c0_2] : memref<4x128xbf16, #tpu.memory_space<vmem>>, vector<4x128xbf16>
    %cst = arith.constant dense<0.000000e+00> : vector<16x128xf32>
    %3 = tpu.matmul %1, %2, %cst {dimension_numbers = #tpu.dot_dimension_numbers<[1], [0], [0], [1], [0, 0, 1, 1], [], []>} : vector<16x4xbf16>, vector<4x128xbf16>, vector<16x128xf32> -> vector<16x128xf32>
    %c0_3 = arith.constant 0 : index
    %c0_4 = arith.constant 0 : index
    %4 = vector.load %arg3[%c0_3, %c0_4] : memref<1x128xf32, #tpu.memory_space<vmem>>, vector<1x128xf32>
    %5 = vector.broadcast %4 : vector<1x128xf32> to vector<16x128xf32>
    %6 = arith.addf %3, %5 : vector<16x128xf32>
    %cst_5 = arith.constant 5.000000e-01 : f32
    %7 = vector.broadcast %cst_5 : f32 to vector<16x128xf32>
    %8 = arith.mulf %7, %6 : vector<16x128xf32>
    %cst_6 = arith.constant 0.707106769 : f32
    %9 = vector.broadcast %cst_6 : f32 to vector<16x128xf32>
    %10 = arith.mulf %6, %9 : vector<16x128xf32>
    %11 = math.erf %10 : vector<16x128xf32>
    %cst_7 = arith.constant 1.000000e+00 : f32
    %12 = vector.broadcast %cst_7 : f32 to vector<16x128xf32>
    %13 = arith.addf %12, %11 : vector<16x128xf32>
    %14 = arith.mulf %8, %13 : vector<16x128xf32>
    %15 = arith.truncf %14 : vector<16x128xf32> to vector<16x128xbf16>
    %c0_8 = arith.constant 0 : index
    %c0_9 = arith.constant 0 : index
    %16 = vector.load %arg4[%c0_8, %c0_9] : memref<128x128xbf16, #tpu.memory_space<vmem>>, vector<128x128xbf16>
    %cst_10 = arith.constant dense<0.000000e+00> : vector<16x128xf32>
    %17 = tpu.matmul %15, %16, %cst_10 {dimension_numbers = #tpu.dot_dimension_numbers<[1], [0], [0], [1], [0, 0, 1, 1], [], []>} : vector<16x128xbf16>, vector<128x128xbf16>, vector<16x128xf32> -> vector<16x128xf32>
    %c0_11 = arith.constant 0 : index
    %c0_12 = arith.constant 0 : index
    %18 = vector.load %arg5[%c0_11, %c0_12] : memref<1x128xf32, #tpu.memory_space<vmem>>, vector<1x128xf32>
    %19 = vector.broadcast %18 : vector<1x128xf32> to vector<16x128xf32>
    %20 = arith.addf %17, %19 : vector<16x128xf32>
    %cst_13 = arith.constant 5.000000e-01 : f32
    %21 = vector.broadcast %cst_13 : f32 to vector<16x128xf32>
    %22 = arith.mulf %21, %20 : vector<16x128xf32>
    %cst_14 = arith.constant 0.707106769 : f32
    %23 = vector.broadcast %cst_14 : f32 to vector<16x128xf32>
    %24 = arith.mulf %20, %23 : vector<16x128xf32>
    %25 = math.erf %24 : vector<16x128xf32>
    %cst_15 = arith.constant 1.000000e+00 : f32
    %26 = vector.broadcast %cst_15 : f32 to vector<16x128xf32>
    %27 = arith.addf %26, %25 : vector<16x128xf32>
    %28 = arith.mulf %22, %27 : vector<16x128xf32>
    %29 = arith.truncf %28 : vector<16x128xf32> to vector<16x128xbf16>
    %c0_16 = arith.constant 0 : index
    %c0_17 = arith.constant 0 : index
    %30 = vector.load %arg6[%c0_16, %c0_17] : memref<128x128xbf16, #tpu.memory_space<vmem>>, vector<128x128xbf16>
    %cst_18 = arith.constant dense<0.000000e+00> : vector<16x128xf32>
    %31 = tpu.matmul %29, %30, %cst_18 {dimension_numbers = #tpu.dot_dimension_numbers<[1], [0], [0], [1], [0, 0, 1, 1], [], []>} : vector<16x128xbf16>, vector<128x128xbf16>, vector<16x128xf32> -> vector<16x128xf32>
    %c0_19 = arith.constant 0 : index
    %c0_20 = arith.constant 0 : index
    %32 = vector.load %arg7[%c0_19, %c0_20] : memref<1x128xf32, #tpu.memory_space<vmem>>, vector<1x128xf32>
    %33 = vector.broadcast %32 : vector<1x128xf32> to vector<16x128xf32>
    %34 = arith.addf %31, %33 : vector<16x128xf32>
    %35 = arith.truncf %34 : vector<16x128xf32> to vector<16x128xbf16>
    %c0_21 = arith.constant 0 : index
    %c0_22 = arith.constant 0 : index
    %36 = vector.load %arg8[%c0_21, %c0_22] : memref<128x128xbf16, #tpu.memory_space<vmem>>, vector<128x128xbf16>
    %cst_23 = arith.constant dense<0.000000e+00> : vector<16x128xf32>
    %37 = tpu.matmul %35, %36, %cst_23 {dimension_numbers = #tpu.dot_dimension_numbers<[1], [0], [0], [1], [0, 0, 1, 1], [], []>} : vector<16x128xbf16>, vector<128x128xbf16>, vector<16x128xf32> -> vector<16x128xf32>
    %c0_24 = arith.constant 0 : index
    %c0_25 = arith.constant 0 : index
    %38 = vector.load %arg9[%c0_24, %c0_25] : memref<1x128xf32, #tpu.memory_space<vmem>>, vector<1x128xf32>
    %39 = vector.broadcast %38 : vector<1x128xf32> to vector<16x128xf32>
    %40 = arith.addf %37, %39 : vector<16x128xf32>
    %cst_26 = arith.constant 5.000000e-01 : f32
    %41 = vector.broadcast %cst_26 : f32 to vector<16x128xf32>
    %42 = arith.mulf %41, %40 : vector<16x128xf32>
    %cst_27 = arith.constant 0.707106769 : f32
    %43 = vector.broadcast %cst_27 : f32 to vector<16x128xf32>
    %44 = arith.mulf %40, %43 : vector<16x128xf32>
    %45 = math.erf %44 : vector<16x128xf32>
    %cst_28 = arith.constant 1.000000e+00 : f32
    %46 = vector.broadcast %cst_28 : f32 to vector<16x128xf32>
    %47 = arith.addf %46, %45 : vector<16x128xf32>
    %48 = arith.mulf %42, %47 : vector<16x128xf32>
    %49 = arith.truncf %48 : vector<16x128xf32> to vector<16x128xbf16>
    %c0_29 = arith.constant 0 : index
    %c0_30 = arith.constant 0 : index
    %50 = vector.load %arg10[%c0_29, %c0_30] : memref<128x128xbf16, #tpu.memory_space<vmem>>, vector<128x128xbf16>
    %cst_31 = arith.constant dense<0.000000e+00> : vector<16x128xf32>
    %51 = tpu.matmul %49, %50, %cst_31 {dimension_numbers = #tpu.dot_dimension_numbers<[1], [0], [0], [1], [0, 0, 1, 1], [], []>} : vector<16x128xbf16>, vector<128x128xbf16>, vector<16x128xf32> -> vector<16x128xf32>
    %c0_32 = arith.constant 0 : index
    %c0_33 = arith.constant 0 : index
    %52 = vector.load %arg11[%c0_32, %c0_33] : memref<1x128xf32, #tpu.memory_space<vmem>>, vector<1x128xf32>
    %53 = vector.broadcast %52 : vector<1x128xf32> to vector<16x128xf32>
    %54 = arith.addf %51, %53 : vector<16x128xf32>
    %cst_34 = arith.constant 5.000000e-01 : f32
    %55 = vector.broadcast %cst_34 : f32 to vector<16x128xf32>
    %56 = arith.mulf %55, %54 : vector<16x128xf32>
    %cst_35 = arith.constant 0.707106769 : f32
    %57 = vector.broadcast %cst_35 : f32 to vector<16x128xf32>
    %58 = arith.mulf %54, %57 : vector<16x128xf32>
    %59 = math.erf %58 : vector<16x128xf32>
    %cst_36 = arith.constant 1.000000e+00 : f32
    %60 = vector.broadcast %cst_36 : f32 to vector<16x128xf32>
    %61 = arith.addf %60, %59 : vector<16x128xf32>
    %62 = arith.mulf %56, %61 : vector<16x128xf32>
    %63 = arith.truncf %62 : vector<16x128xf32> to vector<16x128xbf16>
    %c0_37 = arith.constant 0 : index
    %c0_38 = arith.constant 0 : index
    %64 = vector.load %arg12[%c0_37, %c0_38] : memref<128x256xbf16, #tpu.memory_space<vmem>>, vector<128x256xbf16>
    %cst_39 = arith.constant dense<0.000000e+00> : vector<16x256xf32>
    %65 = tpu.matmul %63, %64, %cst_39 {dimension_numbers = #tpu.dot_dimension_numbers<[1], [0], [0], [1], [0, 0, 1, 1], [], []>} : vector<16x128xbf16>, vector<128x256xbf16>, vector<16x256xf32> -> vector<16x256xf32>
    %c0_40 = arith.constant 0 : index
    %c0_41 = arith.constant 0 : index
    %66 = vector.load %arg13[%c0_40, %c0_41] : memref<1x256xf32, #tpu.memory_space<vmem>>, vector<1x256xf32>
    %67 = vector.broadcast %66 : vector<1x256xf32> to vector<16x256xf32>
    %68 = arith.addf %65, %67 : vector<16x256xf32>
    %c16_i32 = arith.constant 16 : i32
    %69 = arith.muli %arg0, %c16_i32 : i32
    %70 = tpu.iota {dimensions = array<i32: 0>} : vector<16x256xi32>
    %71 = vector.broadcast %69 : i32 to vector<16x256xi32>
    %72 = arith.addi %71, %70 : vector<16x256xi32>
    %c20_i32 = arith.constant 20 : i32
    %73 = vector.broadcast %c20_i32 : i32 to vector<16x256xi32>
    %74 = arith.cmpi slt, %72, %73 : vector<16x256xi32>
    %cst_42 = arith.constant 0xFF800000 : f32
    %75 = vector.broadcast %cst_42 : f32 to vector<16x256xf32>
    %76 = arith.select %74, %68, %75 : vector<16x256xi1>, vector<16x256xf32>
    %cst_43 = arith.constant dense<0xFF800000> : vector<256xf32>
    %77 = vector.multi_reduction <maximumf>, %76, %cst_43 [0] : vector<16x256xf32> to vector<256xf32>
    %78 = vector.shape_cast %77 : vector<256xf32> to vector<1x256xf32>
    %79 = vector.shape_cast %78 : vector<1x256xf32> to vector<1x1x256xf32>
    %c0_44 = arith.constant 0 : index
    %c0_45 = arith.constant 0 : index
    %c0_46 = arith.constant 0 : index
    %80 = vector.load %arg14[%c0_44, %c0_45, %c0_46] : memref<1x1x256xf32, #tpu.memory_space<vmem>>, vector<1x1x256xf32>
    tpu.vector_store %arg14[%c0_44, %c0_45, %c0_46], %79 {strides = array<i32>} : memref<1x1x256xf32, #tpu.memory_space<vmem>>, vector<1x1x256xf32>,
    return
  }
  func.func @transform_0(%arg0: i32) -> (i32, i32) {
    %c0_i32 = arith.constant 0 : i32
    %c0_i32_0 = arith.constant 0 : i32
    return %arg0, %c0_i32 : i32, i32
  }
  func.func @transform_1(%arg0: i32) -> (i32, i32) {
    %c0_i32 = arith.constant 0 : i32
    %c0_i32_0 = arith.constant 0 : i32
    %c0_i32_1 = arith.constant 0 : i32
    return %c0_i32, %c0_i32_0 : i32, i32
  }
  func.func @transform_2(%arg0: i32) -> (i32, i32) {
    %c0_i32 = arith.constant 0 : i32
    %c0_i32_0 = arith.constant 0 : i32
    %c0_i32_1 = arith.constant 0 : i32
    return %c0_i32, %c0_i32_0 : i32, i32
  }
  func.func @transform_3(%arg0: i32) -> (i32, i32) {
    %c0_i32 = arith.constant 0 : i32
    %c0_i32_0 = arith.constant 0 : i32
    %c0_i32_1 = arith.constant 0 : i32
    return %c0_i32, %c0_i32_0 : i32, i32
  }
  func.func @transform_4(%arg0: i32) -> (i32, i32) {
    %c0_i32 = arith.constant 0 : i32
    %c0_i32_0 = arith.constant 0 : i32
    %c0_i32_1 = arith.constant 0 : i32
    return %c0_i32, %c0_i32_0 : i32, i32
  }
  func.func @transform_5(%arg0: i32) -> (i32, i32) {
    %c0_i32 = arith.constant 0 : i32
    %c0_i32_0 = arith.constant 0 : i32
    %c0_i32_1 = arith.constant 0 : i32
    return %c0_i32, %c0_i32_0 : i32, i32
  }
  func.func @transform_6(%arg0: i32) -> (i32, i32) {
    %c0_i32 = arith.constant 0 : i32
    %c0_i32_0 = arith.constant 0 : i32
    %c0_i32_1 = arith.constant 0 : i32
    return %c0_i32, %c0_i32_0 : i32, i32
  }
  func.func @transform_7(%arg0: i32) -> (i32, i32) {
    %c0_i32 = arith.constant 0 : i32
    %c0_i32_0 = arith.constant 0 : i32
    %c0_i32_1 = arith.constant 0 : i32
    return %c0_i32, %c0_i32_0 : i32, i32
  }
  func.func @transform_8(%arg0: i32) -> (i32, i32) {
    %c0_i32 = arith.constant 0 : i32
    %c0_i32_0 = arith.constant 0 : i32
    %c0_i32_1 = arith.constant 0 : i32
    return %c0_i32, %c0_i32_0 : i32, i32
  }
  func.func @transform_9(%arg0: i32) -> (i32, i32) {
    %c0_i32 = arith.constant 0 : i32
    %c0_i32_0 = arith.constant 0 : i32
    %c0_i32_1 = arith.constant 0 : i32
    return %c0_i32, %c0_i32_0 : i32, i32
  }
  func.func @transform_10(%arg0: i32) -> (i32, i32) {
    %c0_i32 = arith.constant 0 : i32
    %c0_i32_0 = arith.constant 0 : i32
    %c0_i32_1 = arith.constant 0 : i32
    return %c0_i32, %c0_i32_0 : i32, i32
  }
  func.func @transform_11(%arg0: i32) -> (i32, i32) {
    %c0_i32 = arith.constant 0 : i32
    %c0_i32_0 = arith.constant 0 : i32
    %c0_i32_1 = arith.constant 0 : i32
    return %c0_i32, %c0_i32_0 : i32, i32
  }
  func.func @transform_12(%arg0: i32) -> (i32, i32) {
    %c0_i32 = arith.constant 0 : i32
    %c0_i32_0 = arith.constant 0 : i32
    %c0_i32_1 = arith.constant 0 : i32
    return %c0_i32, %c0_i32_0 : i32, i32
  }
  func.func @transform_13(%arg0: i32) -> (i32, i32, i32) {
    %c0_i32 = arith.constant 0 : i32
    %c0_i32_0 = arith.constant 0 : i32
    %c0_i32_1 = arith.constant 0 : i32
    return %arg0, %c0_i32, %c0_i32_0 : i32, i32, i32
  }
}

module attributes {stable_mosaic.version = 11 : i64} {
  func.func @_decoder_kernel(%arg0: i32, %arg1: memref<16x4xf32, #tpu.memory_space<vmem>>, %arg2: memref<4x128xbf16, #tpu.memory_space<vmem>>, %arg3: memref<1x128xf32, #tpu.memory_space<vmem>>, %arg4: memref<128x128xbf16, #tpu.memory_space<vmem>>, %arg5: memref<1x128xf32, #tpu.memory_space<vmem>>, %arg6: memref<128x128xbf16, #tpu.memory_space<vmem>>, %arg7: memref<1x128xf32, #tpu.memory_space<vmem>>, %arg8: memref<128x128xbf16, #tpu.memory_space<vmem>>, %arg9: memref<1x128xf32, #tpu.memory_space<vmem>>, %arg10: memref<128x128xbf16, #tpu.memory_space<vmem>>, %arg11: memref<1x128xf32, #tpu.memory_space<vmem>>, %arg12: memref<128x128xbf16, #tpu.memory_space<vmem>>, %arg13: memref<1x128xf32, #tpu.memory_space<vmem>>, %arg14: memref<16x4xf32, #tpu.memory_space<vmem>>) attributes {dimension_semantics = [#tpu.dimension_semantics<parallel>], iteration_bounds = array<i64: 2>, scalar_prefetch = 0 : i64, scratch_operands = 0 : i64, tpu.core_type = #tpu.core_type<tc>, window_params = [{transform_indices = @transform_0, window_bounds = array<i64: 16, 4>}, {pipeline_mode = #tpu.pipeline_mode<synchronous>, transform_indices = @transform_1, window_bounds = array<i64: 4, 128>}, {pipeline_mode = #tpu.pipeline_mode<synchronous>, transform_indices = @transform_2, window_bounds = array<i64: 1, 128>}, {pipeline_mode = #tpu.pipeline_mode<synchronous>, transform_indices = @transform_3, window_bounds = array<i64: 128, 128>}, {pipeline_mode = #tpu.pipeline_mode<synchronous>, transform_indices = @transform_4, window_bounds = array<i64: 1, 128>}, {pipeline_mode = #tpu.pipeline_mode<synchronous>, transform_indices = @transform_5, window_bounds = array<i64: 128, 128>}, {pipeline_mode = #tpu.pipeline_mode<synchronous>, transform_indices = @transform_6, window_bounds = array<i64: 1, 128>}, {pipeline_mode = #tpu.pipeline_mode<synchronous>, transform_indices = @transform_7, window_bounds = array<i64: 128, 128>}, {pipeline_mode = #tpu.pipeline_mode<synchronous>, transform_indices = @transform_8, window_bounds = array<i64: 1, 128>}, {pipeline_mode = #tpu.pipeline_mode<synchronous>, transform_indices = @transform_9, window_bounds = array<i64: 128, 128>}, {pipeline_mode = #tpu.pipeline_mode<synchronous>, transform_indices = @transform_10, window_bounds = array<i64: 1, 128>}, {pipeline_mode = #tpu.pipeline_mode<synchronous>, transform_indices = @transform_11, window_bounds = array<i64: 128, 128>}, {pipeline_mode = #tpu.pipeline_mode<synchronous>, transform_indices = @transform_12, window_bounds = array<i64: 1, 128>}, {transform_indices = @transform_13, window_bounds = array<i64: 16, 4>}]} {
    %c0 = arith.constant 0 : index
    %c0_0 = arith.constant 0 : index
    %0 = vector.load %arg1[%c0, %c0_0] : memref<16x4xf32, #tpu.memory_space<vmem>>, vector<16x4xf32>
    %1 = arith.truncf %0 : vector<16x4xf32> to vector<16x4xbf16>
    %c0_1 = arith.constant 0 : index
    %c0_2 = arith.constant 0 : index
    %2 = vector.load %arg2[%c0_1, %c0_2] : memref<4x128xbf16, #tpu.memory_space<vmem>>, vector<4x128xbf16>
    %cst = arith.constant dense<0.000000e+00> : vector<16x128xf32>
    %3 = tpu.matmul %1, %2, %cst {dimension_numbers = #tpu.dot_dimension_numbers<[1], [0], [0], [1], [0, 0, 1, 1], [], []>} : vector<16x4xbf16>, vector<4x128xbf16>, vector<16x128xf32> -> vector<16x128xf32>
    %c0_3 = arith.constant 0 : index
    %c0_4 = arith.constant 0 : index
    %4 = vector.load %arg3[%c0_3, %c0_4] : memref<1x128xf32, #tpu.memory_space<vmem>>, vector<1x128xf32>
    %5 = vector.broadcast %4 : vector<1x128xf32> to vector<16x128xf32>
    %6 = arith.addf %3, %5 : vector<16x128xf32>
    %cst_5 = arith.constant 5.000000e-01 : f32
    %7 = vector.broadcast %cst_5 : f32 to vector<16x128xf32>
    %8 = arith.mulf %7, %6 : vector<16x128xf32>
    %cst_6 = arith.constant 0.707106769 : f32
    %9 = vector.broadcast %cst_6 : f32 to vector<16x128xf32>
    %10 = arith.mulf %6, %9 : vector<16x128xf32>
    %11 = math.erf %10 : vector<16x128xf32>
    %cst_7 = arith.constant 1.000000e+00 : f32
    %12 = vector.broadcast %cst_7 : f32 to vector<16x128xf32>
    %13 = arith.addf %12, %11 : vector<16x128xf32>
    %14 = arith.mulf %8, %13 : vector<16x128xf32>
    %15 = arith.truncf %14 : vector<16x128xf32> to vector<16x128xbf16>
    %c0_8 = arith.constant 0 : index
    %c0_9 = arith.constant 0 : index
    %16 = vector.load %arg4[%c0_8, %c0_9] : memref<128x128xbf16, #tpu.memory_space<vmem>>, vector<128x128xbf16>
    %cst_10 = arith.constant dense<0.000000e+00> : vector<16x128xf32>
    %17 = tpu.matmul %15, %16, %cst_10 {dimension_numbers = #tpu.dot_dimension_numbers<[1], [0], [0], [1], [0, 0, 1, 1], [], []>} : vector<16x128xbf16>, vector<128x128xbf16>, vector<16x128xf32> -> vector<16x128xf32>
    %c0_11 = arith.constant 0 : index
    %c0_12 = arith.constant 0 : index
    %18 = vector.load %arg5[%c0_11, %c0_12] : memref<1x128xf32, #tpu.memory_space<vmem>>, vector<1x128xf32>
    %19 = vector.broadcast %18 : vector<1x128xf32> to vector<16x128xf32>
    %20 = arith.addf %17, %19 : vector<16x128xf32>
    %cst_13 = arith.constant 5.000000e-01 : f32
    %21 = vector.broadcast %cst_13 : f32 to vector<16x128xf32>
    %22 = arith.mulf %21, %20 : vector<16x128xf32>
    %cst_14 = arith.constant 0.707106769 : f32
    %23 = vector.broadcast %cst_14 : f32 to vector<16x128xf32>
    %24 = arith.mulf %20, %23 : vector<16x128xf32>
    %25 = math.erf %24 : vector<16x128xf32>
    %cst_15 = arith.constant 1.000000e+00 : f32
    %26 = vector.broadcast %cst_15 : f32 to vector<16x128xf32>
    %27 = arith.addf %26, %25 : vector<16x128xf32>
    %28 = arith.mulf %22, %27 : vector<16x128xf32>
    %29 = arith.truncf %28 : vector<16x128xf32> to vector<16x128xbf16>
    %c0_16 = arith.constant 0 : index
    %c0_17 = arith.constant 0 : index
    %30 = vector.load %arg6[%c0_16, %c0_17] : memref<128x128xbf16, #tpu.memory_space<vmem>>, vector<128x128xbf16>
    %cst_18 = arith.constant dense<0.000000e+00> : vector<16x128xf32>
    %31 = tpu.matmul %29, %30, %cst_18 {dimension_numbers = #tpu.dot_dimension_numbers<[1], [0], [0], [1], [0, 0, 1, 1], [], []>} : vector<16x128xbf16>, vector<128x128xbf16>, vector<16x128xf32> -> vector<16x128xf32>
    %c0_19 = arith.constant 0 : index
    %c0_20 = arith.constant 0 : index
    %32 = vector.load %arg7[%c0_19, %c0_20] : memref<1x128xf32, #tpu.memory_space<vmem>>, vector<1x128xf32>
    %33 = vector.broadcast %32 : vector<1x128xf32> to vector<16x128xf32>
    %34 = arith.addf %31, %33 : vector<16x128xf32>
    %35 = arith.truncf %34 : vector<16x128xf32> to vector<16x128xbf16>
    %c0_21 = arith.constant 0 : index
    %c0_22 = arith.constant 0 : index
    %36 = vector.load %arg8[%c0_21, %c0_22] : memref<128x128xbf16, #tpu.memory_space<vmem>>, vector<128x128xbf16>
    %cst_23 = arith.constant dense<0.000000e+00> : vector<16x128xf32>
    %37 = tpu.matmul %35, %36, %cst_23 {dimension_numbers = #tpu.dot_dimension_numbers<[1], [0], [0], [1], [0, 0, 1, 1], [], []>} : vector<16x128xbf16>, vector<128x128xbf16>, vector<16x128xf32> -> vector<16x128xf32>
    %c0_24 = arith.constant 0 : index
    %c0_25 = arith.constant 0 : index
    %38 = vector.load %arg9[%c0_24, %c0_25] : memref<1x128xf32, #tpu.memory_space<vmem>>, vector<1x128xf32>
    %39 = vector.broadcast %38 : vector<1x128xf32> to vector<16x128xf32>
    %40 = arith.addf %37, %39 : vector<16x128xf32>
    %cst_26 = arith.constant 5.000000e-01 : f32
    %41 = vector.broadcast %cst_26 : f32 to vector<16x128xf32>
    %42 = arith.mulf %41, %40 : vector<16x128xf32>
    %cst_27 = arith.constant 0.707106769 : f32
    %43 = vector.broadcast %cst_27 : f32 to vector<16x128xf32>
    %44 = arith.mulf %40, %43 : vector<16x128xf32>
    %45 = math.erf %44 : vector<16x128xf32>
    %cst_28 = arith.constant 1.000000e+00 : f32
    %46 = vector.broadcast %cst_28 : f32 to vector<16x128xf32>
    %47 = arith.addf %46, %45 : vector<16x128xf32>
    %48 = arith.mulf %42, %47 : vector<16x128xf32>
    %49 = arith.truncf %48 : vector<16x128xf32> to vector<16x128xbf16>
    %c0_29 = arith.constant 0 : index
    %c0_30 = arith.constant 0 : index
    %50 = vector.load %arg10[%c0_29, %c0_30] : memref<128x128xbf16, #tpu.memory_space<vmem>>, vector<128x128xbf16>
    %cst_31 = arith.constant dense<0.000000e+00> : vector<16x128xf32>
    %51 = tpu.matmul %49, %50, %cst_31 {dimension_numbers = #tpu.dot_dimension_numbers<[1], [0], [0], [1], [0, 0, 1, 1], [], []>} : vector<16x128xbf16>, vector<128x128xbf16>, vector<16x128xf32> -> vector<16x128xf32>
    %c0_32 = arith.constant 0 : index
    %c0_33 = arith.constant 0 : index
    %52 = vector.load %arg11[%c0_32, %c0_33] : memref<1x128xf32, #tpu.memory_space<vmem>>, vector<1x128xf32>
    %53 = vector.broadcast %52 : vector<1x128xf32> to vector<16x128xf32>
    %54 = arith.addf %51, %53 : vector<16x128xf32>
    %cst_34 = arith.constant 5.000000e-01 : f32
    %55 = vector.broadcast %cst_34 : f32 to vector<16x128xf32>
    %56 = arith.mulf %55, %54 : vector<16x128xf32>
    %cst_35 = arith.constant 0.707106769 : f32
    %57 = vector.broadcast %cst_35 : f32 to vector<16x128xf32>
    %58 = arith.mulf %54, %57 : vector<16x128xf32>
    %59 = math.erf %58 : vector<16x128xf32>
    %cst_36 = arith.constant 1.000000e+00 : f32
    %60 = vector.broadcast %cst_36 : f32 to vector<16x128xf32>
    %61 = arith.addf %60, %59 : vector<16x128xf32>
    %62 = arith.mulf %56, %61 : vector<16x128xf32>
    %63 = arith.truncf %62 : vector<16x128xf32> to vector<16x128xbf16>
    %c0_37 = arith.constant 0 : index
    %c0_38 = arith.constant 0 : index
    %64 = vector.load %arg12[%c0_37, %c0_38] : memref<128x128xbf16, #tpu.memory_space<vmem>>, vector<128x128xbf16>
    %cst_39 = arith.constant dense<0.000000e+00> : vector<16x128xf32>
    %65 = tpu.matmul %63, %64, %cst_39 {dimension_numbers = #tpu.dot_dimension_numbers<[1], [0], [0], [1], [0, 0, 1, 1], [], []>} : vector<16x128xbf16>, vector<128x128xbf16>, vector<16x128xf32> -> vector<16x128xf32>
    %c0_40 = arith.constant 0 : index
    %c0_41 = arith.constant 0 : index
    %66 = vector.load %arg13[%c0_40, %c0_41] : memref<1x128xf32, #tpu.memory_space<vmem>>, vector<1x128xf32>
    %67 = vector.broadcast %66 : vector<1x128xf32> to vector<16x128xf32>
    %68 = arith.addf %65, %67 : vector<16x128xf32>
    %69 = vector.extract_strided_slice %68 {offsets = [0, 0], sizes = [16, 4], strides = [1, 1]} : vector<16x128xf32> to vector<16x4xf32>
    %70 = arith.negf %69 : vector<16x4xf32>
    %71 = math.exp %70 : vector<16x4xf32>
    %cst_42 = arith.constant 1.000000e+00 : f32
    %72 = vector.broadcast %cst_42 : f32 to vector<16x4xf32>
    %73 = arith.addf %72, %71 : vector<16x4xf32>
    %74 = arith.divf %72, %73 : vector<16x4xf32>
    %c0_43 = arith.constant 0 : index
    %c0_44 = arith.constant 0 : index
    %75 = vector.load %arg14[%c0_43, %c0_44] : memref<16x4xf32, #tpu.memory_space<vmem>>, vector<16x4xf32>
    tpu.vector_store %arg14[%c0_43, %c0_44], %74 {strides = array<i32>} : memref<16x4xf32, #tpu.memory_space<vmem>>, vector<16x4xf32>,
    return
  }
  func.func @transform_0(%arg0: i32) -> (i32, i32) {
    %c0_i32 = arith.constant 0 : i32
    %c0_i32_0 = arith.constant 0 : i32
    return %arg0, %c0_i32 : i32, i32
  }
  func.func @transform_1(%arg0: i32) -> (i32, i32) {
    %c0_i32 = arith.constant 0 : i32
    %c0_i32_0 = arith.constant 0 : i32
    %c0_i32_1 = arith.constant 0 : i32
    return %c0_i32, %c0_i32_0 : i32, i32
  }
  func.func @transform_2(%arg0: i32) -> (i32, i32) {
    %c0_i32 = arith.constant 0 : i32
    %c0_i32_0 = arith.constant 0 : i32
    %c0_i32_1 = arith.constant 0 : i32
    return %c0_i32, %c0_i32_0 : i32, i32
  }
  func.func @transform_3(%arg0: i32) -> (i32, i32) {
    %c0_i32 = arith.constant 0 : i32
    %c0_i32_0 = arith.constant 0 : i32
    %c0_i32_1 = arith.constant 0 : i32
    return %c0_i32, %c0_i32_0 : i32, i32
  }
  func.func @transform_4(%arg0: i32) -> (i32, i32) {
    %c0_i32 = arith.constant 0 : i32
    %c0_i32_0 = arith.constant 0 : i32
    %c0_i32_1 = arith.constant 0 : i32
    return %c0_i32, %c0_i32_0 : i32, i32
  }
  func.func @transform_5(%arg0: i32) -> (i32, i32) {
    %c0_i32 = arith.constant 0 : i32
    %c0_i32_0 = arith.constant 0 : i32
    %c0_i32_1 = arith.constant 0 : i32
    return %c0_i32, %c0_i32_0 : i32, i32
  }
  func.func @transform_6(%arg0: i32) -> (i32, i32) {
    %c0_i32 = arith.constant 0 : i32
    %c0_i32_0 = arith.constant 0 : i32
    %c0_i32_1 = arith.constant 0 : i32
    return %c0_i32, %c0_i32_0 : i32, i32
  }
  func.func @transform_7(%arg0: i32) -> (i32, i32) {
    %c0_i32 = arith.constant 0 : i32
    %c0_i32_0 = arith.constant 0 : i32
    %c0_i32_1 = arith.constant 0 : i32
    return %c0_i32, %c0_i32_0 : i32, i32
  }
  func.func @transform_8(%arg0: i32) -> (i32, i32) {
    %c0_i32 = arith.constant 0 : i32
    %c0_i32_0 = arith.constant 0 : i32
    %c0_i32_1 = arith.constant 0 : i32
    return %c0_i32, %c0_i32_0 : i32, i32
  }
  func.func @transform_9(%arg0: i32) -> (i32, i32) {
    %c0_i32 = arith.constant 0 : i32
    %c0_i32_0 = arith.constant 0 : i32
    %c0_i32_1 = arith.constant 0 : i32
    return %c0_i32, %c0_i32_0 : i32, i32
  }
  func.func @transform_10(%arg0: i32) -> (i32, i32) {
    %c0_i32 = arith.constant 0 : i32
    %c0_i32_0 = arith.constant 0 : i32
    %c0_i32_1 = arith.constant 0 : i32
    return %c0_i32, %c0_i32_0 : i32, i32
  }
  func.func @transform_11(%arg0: i32) -> (i32, i32) {
    %c0_i32 = arith.constant 0 : i32
    %c0_i32_0 = arith.constant 0 : i32
    %c0_i32_1 = arith.constant 0 : i32
    return %c0_i32, %c0_i32_0 : i32, i32
  }
  func.func @transform_12(%arg0: i32) -> (i32, i32) {
    %c0_i32 = arith.constant 0 : i32
    %c0_i32_0 = arith.constant 0 : i32
    %c0_i32_1 = arith.constant 0 : i32
    return %c0_i32, %c0_i32_0 : i32, i32
  }
  func.func @transform_13(%arg0: i32) -> (i32, i32) {
    %c0_i32 = arith.constant 0 : i32
    %c0_i32_0 = arith.constant 0 : i32
    return %arg0, %c0_i32 : i32, i32
  }
}

</mosaic_0001>

<bundles_post_ra>
// kernel: pointnet_forward.2
= control target key start
LH: loop header
LB: loop body
LE: loop exit
PB: predicated region body
PF: predicated region fallthrough
CT: control target
= control target key end

     0   :  { %s1624_s25 = smov 0   ;;  %s1855_s0 = inlined_call_operand.vmem [shape: f32[20,4], index: 0, kind: input, shape index: {}]   ;;  %s1856_s1 = inlined_call_operand.vmem [shape: bf16[4,128], index: 1, kind: input, shape index: {}]   ;;  %s1857_s2 = inlined_call_operand.vmem [shape: f32[1,128], index: 2, kind: input, shape index: {}]   ;;  %s1858_s3 = inlined_call_operand.vmem [shape: bf16[128,128], index: 3, kind: input, shape index: {}]   ;;  %s1859_s4 = inlined_call_operand.vmem [shape: f32[1,128], index: 4, kind: input, shape index: {}]   ;;  %s1860_s5 = inlined_call_operand.vmem [shape: bf16[128,128], index: 5, kind: input, shape index: {}]   ;;  %s1861_s6 = inlined_call_operand.vmem [shape: f32[1,128], index: 6, kind: input, shape index: {}]   ;;  %s1862_s7 = inlined_call_operand.vmem [shape: bf16[128,128], index: 7, kind: input, shape index: {}]   ;;  %s1863_s8 = inlined_call_operand.vmem [shape: f32[1,128], index: 8, kind: input, shape index: {}]   ;;  %s1864_s9 = inlined_call_operand.vmem [shape: bf16[128,128], index: 9, kind: input, shape index: {}]   ;;  %s1865_s10 = inlined_call_operand.vmem [shape: f32[1,128], index: 10, kind: input, shape index: {}]   ;;  %s1866_s11 = inlined_call_operand.vmem [shape: bf16[128,256], index: 11, kind: input, shape index: {}]   ;;  %s1867_s12 = inlined_call_operand.vmem [shape: f32[1,256], index: 12, kind: input, shape index: {}]   ;;  %s1868_s13 = inlined_call_operand.vmem [shape: f32[2,1,256], index: 13, kind: output, shape index: {}]  }
   0x1 LB: > { %s1630_s26 = sadd.s32 4294967295, %s1548_s25   ;;  %p1273_p0 = scmp.ge.s32.totalorder %s1548_s25, 1  ;;  %s1548_s25 = sphi %s1624_s25, %s23_s25  }
   0x2   : > { %p396_p1 = scmp.lt.s32.totalorder %s1548_s25, 3 }
   0x4   : > { %p397_p2 = pnand %p1273_p0, %p396_p1 }
   0x5   : > { %v465_v0 = vld [vmem:[%s1856_s1] sm:$0x3] (!%p397_p2)  ;;  %vm477_vm0 = vcmask (!%p397_p2), 1041408   ;;  %s1274_s29 = sshll.u32 (!%p397_p2), %s1630_s26, 1  ;;  %v1550_v1 = vmov (!%p397_p2), 0.0   ;;  %vm1551_vm1 = vmmov (!%p397_p2), 0  }
   0x6   : > { %400 = sbr.rel (%p397_p2) target bundleno = 1416 (0x588), region = 72  ;;  %1372 = vmatprep.subr.bf16.mxu0 (!%p397_p2), %v1550_v1  ;;  %v479_v2 = vsel (!%p397_p2), %vm477_vm0, %v465_v0, 0  ;;  %1374 = vmatprep.mubr.msk.bf16.mxu0 (!%p397_p2), %vm1551_vm1, %v1550_v1  ;;  %p448_p3 = scmp.lt.s32.totalorder (!%p397_p2), %s1274_s29, 2  ;;  %v1470_v3 = vld [vmem:[%s1858_s3] sm:$0xff] (!%p397_p2)   ;;  %v1471_v4 = vld [vmem:[%s1858_s3 + $0x8] sm:$0xff] (!%p397_p2)   ;;  %vm473_vm2 = vcmask (!%p397_p2), 31744  }
   0x7   : > { %1373 = vmatpush3.bf16.msra.mxu0 (!%p397_p2), %v479_v2  ;;  %1378 = vmatprep.subr.bf16.mxu1 (!%p397_p2), %v1550_v1  ;;  %v1472_v8 = vld [vmem:[%s1858_s3 + $0x10] sm:$0xff] (!%p397_p2)   ;;  %v1473_v9 = vld [vmem:[%s1858_s3 + $0x18] sm:$0xff] (!%p397_p2)   ;;  %v1474_v10 = vld [vmem:[%s1858_s3 + $0x20] sm:$0xff] (!%p397_p2)   ;;  %s1331_s18 = sshll.u32 (!%p397_p2), %s1630_s26, 4  ;;  %p457_p4 = scmp.lt.s32.totalorder (!%p397_p2), %s1630_s26, 1 }
   0x8   : > { %1379 = vmatpush3.bf16.msra.mxu1 (!%p397_p2), %v1470_v3  ;;  %1394 = vmatprep.mubr.msk.bf16.mxu1 (!%p397_p2), %vm1551_vm1, %v1550_v1  ;;  %v1475_v11 = vld [vmem:[%s1858_s3 + $0x28] sm:$0xff] (!%p397_p2)   ;;  %v1476_v12 = vld [vmem:[%s1858_s3 + $0x30] sm:$0xff] (!%p397_p2)   ;;  %v1477_v13 = vld [vmem:[%s1858_s3 + $0x38] sm:$0xff] (!%p397_p2)  }
   0x9   : > { %1380 = vmatprep.subr.bf16.mxu1 (!%p397_p2), %v1550_v1  ;;  %1398 = vmatprep.subr.bf16.mxu0 (!%p397_p2), %v1550_v1  ;;  %v1478_v14 = vld [vmem:[%s1860_s5] sm:$0xff] (!%p397_p2)   ;;  %v1479_v15 = vld [vmem:[%s1860_s5 + $0x8] sm:$0xff] (!%p397_p2)   ;;  %v1480_v34 = vld [vmem:[%s1860_s5 + $0x10] sm:$0xff] (!%p397_p2)  }
   0xa   : > { %v1277_v16 = vld [vmem:[%s1857_s2] ss:$0 sm:$0xff] (!%p397_p2)  ;;  %v1481_v35 = vld [vmem:[%s1860_s5 + $0x18] sm:$0xff] (!%p397_p2)   ;;  %v1483_v37 = vld [vmem:[%s1860_s5 + $0x28] sm:$0xff] (!%p397_p2)  }
   0xb   : > { %v1482_v36 = vld [vmem:[%s1860_s5 + $0x20] sm:$0xff] (!%p397_p2)   ;;  %v1484_v38 = vld [vmem:[%s1860_s5 + $0x30] sm:$0xff] (!%p397_p2)   ;;  %v1485_v39 = vld [vmem:[%s1860_s5 + $0x38] sm:$0xff] (!%p397_p2)  }
   0xc   : > { %1381 = vmatpush3.bf16.msra.mxu1 (!%p397_p2), %v1471_v4  ;;  %v1486_v40 = vld [vmem:[%s1862_s7] sm:$0xff] (!%p397_p2)   ;;  %v1487_v41 = vld [vmem:[%s1862_s7 + $0x8] sm:$0xff] (!%p397_p2)   ;;  %v1488_v42 = vld [vmem:[%s1862_s7 + $0x10] sm:$0xff] (!%p397_p2)  }
   0xd   : > { %s1870_s29 = smov (!%p448_p3, %s1274_s29), 2  ;;  %1382 = vmatprep.subr.bf16.mxu1 %v1550_v1  ;;  %v1489_v43 = vld [vmem:[%s1862_s7 + $0x18] sm:$0xff]   ;;  %v1490_v44 = vld [vmem:[%s1862_s7 + $0x20] sm:$0xff]   ;;  %v1491_v45 = vld [vmem:[%s1862_s7 + $0x28] sm:$0xff]   ;;  %s1872_s26 = smov (!%p457_p4, %s1630_s26), 1 }
   0xe   : > { %s1275_s17 = sshll.u32 %s1870_s29, 3  ;;  %v1279_v46 = vld [vmem:[%s1859_s4] ss:$0 sm:$0xff]  ;;  %v1492_v0 = vld [vmem:[%s1862_s7 + $0x30] sm:$0xff]   ;;  %v1493_v2 = vld [vmem:[%s1862_s7 + $0x38] sm:$0xff]   ;;  %s1276_s21 = sshll.u32 %s1872_s26, 1 }
   0xf   : > { %s451_s20 = scalar_lea.vmem %s1855_s0, %s1275_s17  ;;  %v1494_v3 = vld [vmem:[%s1864_s9] sm:$0xff]   ;;  %v1495_v4 = vld [vmem:[%s1864_s9 + $0x8] sm:$0xff]   ;;  %s460_s24 = scalar_lea.vmem %s1868_s13, %s1276_s21 }
  0x10   : > { %v462_v5 = vld [vmem:[%s451_s20] sm:$0xff]  ;;  %v463_v6 = vld [vmem:[%s451_s20 + $0x8] sm:$0xff]  ;;  %1383 = vmatpush3.bf16.msra.mxu1 %v1472_v8 }
  0x11   : > { %v464_v7 = vpack.c.bf16 %v463_v6, %v462_v5  ;;  %1384 = vmatprep.subr.bf16.mxu1 %v1550_v1  ;;  %v1288_v5 = vld [vmem:[%s1861_s6] ss:$0 sm:$0xff] }
  0x13   : > { %1375 = vmatmul.mubr.msk.bf16.vlgmr.msra.gmra.mrb[0].mxu0 %vm473_vm2, %v464_v7 }
  0x14   : > { %1414 = vmatprep.mubr.msk.bf16.mxu0 %vm1551_vm1, %v1550_v1  ;;  %1385 = vmatpush3.bf16.msra.mxu1 %v1473_v9 }
  0x15   : > { %1386 = vmatprep.subr.bf16.mxu1 %v1550_v1  ;;  %1399 = vmatpush3.bf16.msra.mxu0 %v1478_v14  ;;  %v1497_v14 = vld [vmem:[%s1864_s9 + $0x18] sm:$0xff]  }
  0x16   : > { %1400 = vmatprep.subr.bf16.mxu0 %v1550_v1 }
  0x18   : > { %1387 = vmatpush3.bf16.msra.mxu1 %v1474_v10 }
  0x19   : > { %1388 = vmatprep.subr.bf16.mxu1 %v1550_v1  ;;  %1401 = vmatpush3.bf16.msra.mxu0 %v1479_v15  ;;  %v1498_v15 = vld [vmem:[%s1864_s9 + $0x20] sm:$0xff]  }
  0x1a   : > { %1402 = vmatprep.subr.bf16.mxu0 %v1550_v1 }
  0x1c   : > { %1389 = vmatpush3.bf16.msra.mxu1 %v1475_v11 }
  0x1d   : > { %1390 = vmatprep.subr.bf16.mxu1 %v1550_v1  ;;  %1403 = vmatpush3.bf16.msra.mxu0 %v1480_v34 }
  0x1e   : > { %1404 = vmatprep.subr.bf16.mxu0 %v1550_v1 }
  0x20   : > { %1391 = vmatpush3.bf16.msra.mxu1 %v1476_v12 }
  0x21   : > { %1392 = vmatprep.subr.bf16.mxu1 %v1550_v1  ;;  %1405 = vmatpush3.bf16.msra.mxu0 %v1481_v35 }
  0x22   : > { %1406 = vmatprep.subr.bf16.mxu0 %v1550_v1 }
  0x24   : > { %1393 = vmatpush3.bf16.msra.mxu1 %v1477_v13  ;;  %v1496_v13 = vld [vmem:[%s1864_s9 + $0x10] sm:$0xff]  }
  0x25   : > { %1418 = vmatprep.subr.bf16.mxu1 %v1550_v1  ;;  %1407 = vmatpush3.bf16.msra.mxu0 %v1482_v36 }
  0x26   : > { %1408 = vmatprep.subr.bf16.mxu0 %v1550_v1 }
  0x29   : > { %1409 = vmatpush3.bf16.msra.mxu0 %v1483_v37 }
  0x2a   : > { %1410 = vmatprep.subr.bf16.mxu0 %v1550_v1 }
  0x2d   : > { %1411 = vmatpush3.bf16.msra.mxu0 %v1484_v38 }
  0x2e   : > { %1412 = vmatprep.subr.bf16.mxu0 %v1550_v1 }
  0x31   : > { %1413 = vmatpush3.bf16.msra.mxu0 %v1485_v39 }
  0x32   : > { %1438 = vmatprep.subr.bf16.mxu0 %v1550_v1 }
  0xe6   : > { %v515_v17 = vpop.f32.mrb[0].mxu0 }
  0xe7   : > { %v516_v18 = vadd.f32 %v1277_v16, %v515_v17  ;;  %v1376_v19 = vpop.f32.mrb[1].mxu0  ;;  %v1500_v17 = vld [vmem:[%s1864_s9 + $0x30] sm:$0xff]  }
  0xe8   : > { %v518_v20 = vpop.f32.mrb[2].mxu0  ;;  %v1502_v19 = vld [vmem:[%s1866_s11] ss:$8 sps:$4 sm:$0xff]  }
  0xe9   : > { %v524_v21 = vmul.f32 0.70710677, %v516_v18  ;;  %v519_v22 = vadd.f32 %v1277_v16, %v518_v20  ;;  %v1377_v23 = vpop.f32.mrb[3].mxu0  ;;  %v522_v28 = vmul.f32 0.5, %v516_v18  ;;  %v1499_v16 = vld [vmem:[%s1864_s9 + $0x28] sm:$0xff]   ;;  %v1501_v18 = vld [vmem:[%s1864_s9 + $0x38] sm:$0xff]  }
  0xea   : > { %v1504_v20 = vld [vmem:[%s1866_s11 + $0x4] ss:$8 sps:$4 sm:$0xff]  }
  0xeb   : > { %1526 = verf.f32 %v524_v21  ;;  %v525_v24 = vmul.f32 0.70710677, %v519_v22  ;;  %v523_v29 = vmul.f32 0.5, %v519_v22  ;;  %v1507_v21 = vld [vmem:[%s1866_s11 + $0x14] ss:$8 sps:$4 sm:$0xff]  }
  0xec   : > { %v1297_v22 = vld [vmem:[%s1863_s8] ss:$0 sm:$0xff] }
  0xed   : > { %1528 = verf.f32 %v525_v24 }
  0xf5   : > { %v1527_v25 = vpop.eup %1526 }
  0xf6   : > { %v528_v26 = vadd.f32 1.0, %v1527_v25 }
  0xf7   : > { %v1529_v27 = vpop.eup %1528 }
  0xf8   : > { %v529_v30 = vadd.f32 1.0, %v1529_v27  ;;  %v530_v31 = vmul.f32 %v528_v26, %v522_v28 }
  0xfa   : > { %v531_v32 = vmul.f32 %v529_v30, %v523_v29 }
  0xfc   : > { %v532_v33 = vpack.c.bf16 %v531_v32, %v530_v31 }
  0xfe   : > { %1395 = vmatmul.mubr.bf16.vlgmr.msra.gmra.mrb[0].mxu1 %v532_v33 }
  0xff   : > { %1434 = vmatprep.mubr.msk.bf16.mxu1 %vm1551_vm1, %v1550_v1  ;;  %1419 = vmatpush3.bf16.msra.mxu1 %v1486_v40  ;;  %v1510_v40 = vld [vmem:[%s1866_s11 + $0x24] ss:$8 sps:$4 sm:$0xff]  }
 0x100   : > { %1420 = vmatprep.subr.bf16.mxu1 %v1550_v1 }
 0x103   : > { %1421 = vmatpush3.bf16.msra.mxu1 %v1487_v41  ;;  %v1508_v41 = vld [vmem:[%s1866_s11 + $0x20] ss:$8 sps:$4 sm:$0xff]  }
 0x104   : > { %1422 = vmatprep.subr.bf16.mxu1 %v1550_v1 }
 0x107   : > { %1423 = vmatpush3.bf16.msra.mxu1 %v1488_v42  ;;  %v1513_v42 = vld [vmem:[%s1866_s11 + $0x34] ss:$8 sps:$4 sm:$0xff]  }
 0x108   : > { %1424 = vmatprep.subr.bf16.mxu1 %v1550_v1 }
 0x10b   : > { %1425 = vmatpush3.bf16.msra.mxu1 %v1489_v43  ;;  %v1511_v43 = vld [vmem:[%s1866_s11 + $0x30] ss:$8 sps:$4 sm:$0xff]  }
 0x10c   : > { %1426 = vmatprep.subr.bf16.mxu1 %v1550_v1 }
 0x10f   : > { %1427 = vmatpush3.bf16.msra.mxu1 %v1490_v44  ;;  %v1516_v44 = vld [vmem:[%s1866_s11 + $0x44] ss:$8 sps:$4 sm:$0xff]  }
 0x110   : > { %1428 = vmatprep.subr.bf16.mxu1 %v1550_v1 }
 0x113   : > { %1429 = vmatpush3.bf16.msra.mxu1 %v1491_v45  ;;  %v1514_v45 = vld [vmem:[%s1866_s11 + $0x40] ss:$8 sps:$4 sm:$0xff]  }
 0x114   : > { %1430 = vmatprep.subr.bf16.mxu1 %v1550_v1 }
 0x117   : > { %1431 = vmatpush3.bf16.msra.mxu1 %v1492_v0 }
 0x118   : > { %1432 = vmatprep.subr.bf16.mxu1 %v1550_v1 }
 0x11b   : > { %1433 = vmatpush3.bf16.msra.mxu1 %v1493_v2 }
 0x11c   : > { %1123 = vmatprep.subr.bf16.mxu1 %v1504_v20 }
 0x1d1   : > { %v638_v47 = vpop.f32.mrb[0].mxu1 }
 0x1d2   : > { %v639_v48 = vadd.f32 %v1279_v46, %v638_v47  ;;  %v1396_v49 = vpop.f32.mrb[1].mxu1  ;;  %v1517_v47 = vld [vmem:[%s1866_s11 + $0x50] ss:$8 sps:$4 sm:$0xff]  }
 0x1d3   : > { %v641_v50 = vpop.f32.mrb[2].mxu1  ;;  %v1520_v49 = vld [vmem:[%s1866_s11 + $0x60] ss:$8 sps:$4 sm:$0xff]  }
 0x1d4   : > { %v647_v51 = vmul.f32 0.70710677, %v639_v48  ;;  %v642_v52 = vadd.f32 %v1279_v46, %v641_v50  ;;  %v1397_v53 = vpop.f32.mrb[3].mxu1  ;;  %v645_v58 = vmul.f32 0.5, %v639_v48  ;;  %v1519_v46 = vld [vmem:[%s1866_s11 + $0x54] ss:$8 sps:$4 sm:$0xff]  }
 0x1d5   : > { %v1522_v48 = vld [vmem:[%s1866_s11 + $0x64] ss:$8 sps:$4 sm:$0xff]   ;;  %v1525_v50 = vld [vmem:[%s1866_s11 + $0x74] ss:$8 sps:$4 sm:$0xff]   ;;  %v1306_v53 = vld [vmem:[%s1865_s10] ss:$0 sm:$0xff] }
 0x1d6   : > { %1530 = verf.f32 %v647_v51  ;;  %v648_v54 = vmul.f32 0.70710677, %v642_v52  ;;  %v646_v59 = vmul.f32 0.5, %v642_v52  ;;  %v1523_v51 = vld [vmem:[%s1866_s11 + $0x70] ss:$8 sps:$4 sm:$0xff]   ;;  %v1552_v52 = vmov 0  }
 0x1d8   : > { %1532 = verf.f32 %v648_v54 }
 0x1e0   : > { %v1531_v55 = vpop.eup %1530 }
 0x1e1   : > { %v651_v56 = vadd.f32 1.0, %v1531_v55 }
 0x1e2   : > { %v1533_v57 = vpop.eup %1532 }
 0x1e3   : > { %v652_v60 = vadd.f32 1.0, %v1533_v57  ;;  %v653_v61 = vmul.f32 %v651_v56, %v645_v58 }
 0x1e5   : > { %v654_v62 = vmul.f32 %v652_v60, %v646_v59 }
 0x1e7   : > { %v655_v63 = vpack.c.bf16 %v654_v62, %v653_v61 }
 0x1e9   : > { %1415 = vmatmul.mubr.bf16.vlgmr.msra.gmra.mrb[4].mxu0 %v655_v63 }
 0x1ea   : > { %1454 = vmatprep.mubr.msk.bf16.mxu0 %vm1551_vm1, %v1550_v1  ;;  %1439 = vmatpush3.bf16.msra.mxu0 %v1494_v3 }
 0x1eb   : > { %1440 = vmatprep.subr.bf16.mxu0 %v1550_v1 }
 0x1ee   : > { %1441 = vmatpush3.bf16.msra.mxu0 %v1495_v4 }
 0x1ef   : > { %1442 = vmatprep.subr.bf16.mxu0 %v1550_v1 }
 0x1f2   : > { %1443 = vmatpush3.bf16.msra.mxu0 %v1496_v13 }
 0x1f3   : > { %1444 = vmatprep.subr.bf16.mxu0 %v1550_v1 }
 0x1f6   : > { %1445 = vmatpush3.bf16.msra.mxu0 %v1497_v14  ;;  %v1170_v14 = vstv %s1331_s18 }
 0x1f7   : > { %1446 = vmatprep.subr.bf16.mxu0 %v1550_v1 }
 0x1fa   : > { %1447 = vmatpush3.bf16.msra.mxu0 %v1498_v15 }
 0x1fb   : > { %1448 = vmatprep.subr.bf16.mxu0 %v1550_v1 }
 0x1fe   : > { %1449 = vmatpush3.bf16.msra.mxu0 %v1499_v16 }
 0x1ff   : > { %1450 = vmatprep.subr.bf16.mxu0 %v1550_v1 }
 0x202   : > { %1451 = vmatpush3.bf16.msra.mxu0 %v1500_v17 }
 0x203   : > { %1452 = vmatprep.subr.bf16.mxu0 %v1550_v1  ;;  %v1505_v1 = vld [vmem:[%s1866_s11 + $0x10] ss:$8 sps:$4 sm:$0xff]  }
 0x206   : > { %1453 = vmatpush3.bf16.msra.mxu0 %v1501_v18 }
 0x2bc   : > { %v761_v6 = vpop.f32.mrb[4].mxu0 }
 0x2bd   : > { %v1416_v7 = vpop.f32.mrb[5].mxu0  ;;  %v762_v9 = vadd.f32 %v1288_v5, %v761_v6 }
 0x2be   : > { %v764_v8 = vpop.f32.mrb[6].mxu0 }
 0x2bf   : > { %v765_v10 = vadd.f32 %v1288_v5, %v764_v8  ;;  %v1417_v11 = vpop.f32.mrb[7].mxu0  ;;  %v1033_v8 = vlaneseq }
 0x2c0   : > { %v1031_v11 = vld [vmem:[%s1867_s12] sm:$0x3] }
 0x2c1   : > { %v768_v12 = vpack.c.bf16 %v765_v10, %v762_v9  ;;  %v1034_v9 = vshrl.u32 %v1033_v8, 7  ;;  %vm1213_vm5 = vcmp.lt.s32.totalorder %v1033_v8, 256 }
 0x2c3   : > { %1435 = vmatmul.mubr.bf16.vlgmr.msra.gmra.mrb[4].mxu1 %v768_v12  ;;  %v1035_v10 = vsub.s32 0, %v1034_v9  ;;  %v1039_v12 = vsub.s32 1, %v1034_v9  ;;  %v1169_v13 = vadd.s32 8, %v1034_v9  ;;  %v1171_v16 = vadd.s32 %v1170_v14, %v1034_v9 }
 0x2c4   : > { %1124 = vmatpush1.bf16.msra.mxu1 %v1502_v19  ;;  %1155 = vmatprep.mubr.bf16.mxu1 %v1552_v52 }
 0x2c5   : > { %1125 = vmatprep.subr.bf16.mxu1 %v1507_v21  ;;  %v1036_v15 = vrot.slane %v1031_v11, %v1035_v10  ;;  %v1040_v17 = vrot.slane %v1031_v11, %v1039_v12  ;;  %v1172_v18 = vadd.s32 %v1170_v14, %v1169_v13  ;;  %vm1173_vm3 = vcmp.lt.s32.totalorder %v1171_v16, 20 }
 0x2c7   : > { %vm1174_vm4 = vcmp.lt.s32.totalorder %v1172_v18, 20 }
 0x2c8   : > { %1126 = vmatpush1.bf16.msra.mxu1 %v1505_v1 }
 0x2c9   : > { %1127 = vmatprep.subr.bf16.mxu1 %v1510_v40 }
 0x2cc   : > { %1128 = vmatpush1.bf16.msra.mxu1 %v1508_v41 }
 0x2cd   : > { %1129 = vmatprep.subr.bf16.mxu1 %v1513_v42 }
 0x2d0   : > { %1130 = vmatpush1.bf16.msra.mxu1 %v1511_v43 }
 0x2d1   : > { %1131 = vmatprep.subr.bf16.mxu1 %v1516_v44 }
 0x2d4   : > { %1132 = vmatpush1.bf16.msra.mxu1 %v1514_v45 }
 0x2d5   : > { %1133 = vmatprep.subr.bf16.mxu1 %v1519_v46 }
 0x2d8   : > { %1134 = vmatpush1.bf16.msra.mxu1 %v1517_v47 }
 0x2d9   : > { %1135 = vmatprep.subr.bf16.mxu1 %v1522_v48 }
 0x2dc   : > { %1136 = vmatpush1.bf16.msra.mxu1 %v1520_v49 }
 0x2dd   : > { %1137 = vmatprep.subr.bf16.mxu1 %v1525_v50 }
 0x2e0   : > { %1138 = vmatpush1.bf16.msra.mxu1 %v1523_v51 }
 0x396   : > { %v874_v23 = vpop.f32.mrb[4].mxu1 }
 0x397   : > { %v875_v24 = vadd.f32 %v1297_v22, %v874_v23  ;;  %v1436_v25 = vpop.f32.mrb[5].mxu1 }
 0x398   : > { %v877_v26 = vpop.f32.mrb[6].mxu1 }
 0x399   : > { %v883_v27 = vmul.f32 0.70710677, %v875_v24  ;;  %v878_v28 = vadd.f32 %v1297_v22, %v877_v26  ;;  %v1437_v29 = vpop.f32.mrb[7].mxu1  ;;  %v881_v34 = vmul.f32 0.5, %v875_v24 }
 0x39b   : > { %1534 = verf.f32 %v883_v27  ;;  %v884_v30 = vmul.f32 0.70710677, %v878_v28  ;;  %v882_v35 = vmul.f32 0.5, %v878_v28 }
 0x39d   : > { %1536 = verf.f32 %v884_v30 }
 0x3a5   : > { %v1535_v31 = vpop.eup %1534 }
 0x3a6   : > { %v887_v32 = vadd.f32 1.0, %v1535_v31 }
 0x3a7   : > { %v1537_v33 = vpop.eup %1536 }
 0x3a8   : > { %v888_v36 = vadd.f32 1.0, %v1537_v33  ;;  %v889_v37 = vmul.f32 %v887_v32, %v881_v34 }
 0x3aa   : > { %v890_v38 = vmul.f32 %v888_v36, %v882_v35  ;;  %v1553_v36 = vmov 1966171168  }
 0x3ac   : > { %v891_v39 = vpack.c.bf16 %v890_v38, %v889_v37  ;;  %v1197_v37 = vunpack.c.l.s4 %v1553_v36 }
 0x3ae   : > { %1455 = vmatmul.mubr.bf16.vlgmr.msra.gmra.mrb[8].mxu0 %v891_v39  ;;  %v1198_v42 = vunpack.c.0.s8 %v1197_v37 }
 0x3b0   : > { %v1201_v47 = vsub.s32 %v1198_v42, %v1034_v9 }
 0x481   : > { %v997_v54 = vpop.f32.mrb[8].mxu0 }
 0x482   : > { %v998_v55 = vadd.f32 %v1306_v53, %v997_v54  ;;  %v1456_v56 = vpop.f32.mrb[9].mxu0 }
 0x483   : > { %v1000_v57 = vpop.f32.mrb[10].mxu0 }
 0x484   : > { %v1006_v58 = vmul.f32 0.70710677, %v998_v55  ;;  %v1001_v59 = vadd.f32 %v1306_v53, %v1000_v57  ;;  %v1457_v60 = vpop.f32.mrb[11].mxu0  ;;  %v1004_v2 = vmul.f32 0.5, %v998_v55 }
 0x486   : > { %1538 = verf.f32 %v1006_v58  ;;  %v1007_v61 = vmul.f32 0.70710677, %v1001_v59  ;;  %v1005_v3 = vmul.f32 0.5, %v1001_v59 }
 0x488   : > { %1540 = verf.f32 %v1007_v61 }
 0x490   : > { %v1539_v62 = vpop.eup %1538 }
 0x491   : > { %v1010_v63 = vadd.f32 1.0, %v1539_v62 }
 0x492   : > { %v1541_v0 = vpop.eup %1540 }
 0x493   : > { %v1011_v4 = vadd.f32 1.0, %v1541_v0  ;;  %v1012_v5 = vmul.f32 %v1010_v63, %v1004_v2 }
 0x495   : > { %v1013_v6 = vmul.f32 %v1011_v4, %v1005_v3 }
 0x497   : > { %v1014_v7 = vpack.c.bf16 %v1013_v6, %v1012_v5 }
 0x499   : > { %1156 = vmatmul.mubr.bf16.vlgmr.msra.gmra.mrb[8].mxu1 %v1014_v7 }
 0x56c   : > { %v1157_v19 = vpop.f32.mrb[8].mxu1 }
 0x56d   : > { %v1158_v20 = vadd.f32 %v1157_v19, %v1036_v15  ;;  %v1159_v21 = vpop.f32.mrb[9].mxu1 }
 0x56e   : > { %v1160_v1 = vadd.f32 %v1159_v21, %v1040_v17  ;;  %v1161_v22 = vpop.f32.mrb[10].mxu1 }
 0x56f   : > { %v1162_v23 = vadd.f32 %v1161_v22, %v1036_v15  ;;  %v1163_v24 = vpop.f32.mrb[11].mxu1  ;;  %v1175_v26 = vsel %vm1173_vm3, %v1158_v20, -inf }
 0x570   : > { %v1164_v25 = vadd.f32 %v1163_v24, %v1040_v17  ;;  %v1176_v28 = vsel %vm1173_vm3, %v1160_v1, -inf }
 0x571   : > { %v1177_v27 = vsel %vm1174_vm4, %v1162_v23, -inf }
 0x572   : > { %v1179_v29 = vmax.f32 %v1175_v26, %v1177_v27  ;;  %v1178_v30 = vsel %vm1174_vm4, %v1164_v25, -inf }
 0x573   : > { %v1186_v31 = vmax.f32 %v1176_v28, %v1178_v30 }
 0x574   : > { %v1180_v32 = vrot.slane %v1179_v29, 4 }
 0x575   : > { %v1187_v33 = vrot.slane %v1186_v31, 4 }
 0x576   : > { %v1181_v34 = vmax.f32 %v1179_v29, %v1180_v32 }
 0x577   : > { %v1188_v35 = vmax.f32 %v1186_v31, %v1187_v33 }
 0x578   : > { %v1182_v38 = vrot.slane %v1181_v34, 2 }
 0x579   : > { %v1189_v39 = vrot.slane %v1188_v35, 2 }
 0x57a   : > { %v1183_v40 = vmax.f32 %v1181_v34, %v1182_v38 }
 0x57b   : > { %v1190_v41 = vmax.f32 %v1188_v35, %v1189_v39 }
 0x57c   : > { %v1184_v43 = vrot.slane %v1183_v40, 1 }
 0x57d   : > { %v1191_v44 = vrot.slane %v1190_v41, 1 }
 0x57e   : > { %v1185_v45 = vmax.f32 %v1183_v40, %v1184_v43 }
 0x57f   : > { %v1192_v46 = vmax.f32 %v1190_v41, %v1191_v44 }
 0x581   : > { %v1195_v48 = vcombine.low %v1185_v45, %v1192_v46 }
 0x583   : > { %v1202_v49 = vrot.slane %v1195_v48, %v1201_v47 }
 0x585   : > { %v1209_v50 = vrot.slane %v1202_v49, %v1201_v47 }
 0x587   : > { %1215 = vst.msk [vmem:[%s460_s24] sm:$0x3] %vm1213_vm5, %v1209_v50 }
 0x588 PF: > { %s23_s25 = sadd.s32 1, %s1548_s25  }
 0x589   : > { %p20_p5 = scmp.ge.s32.totalorder %s23_s25, 4  }
 0x58b   :  { %22 = sbr.rel (!%p20_p5) target bundleno = 1 (0x1), region = 102 }

// kernel: pointnet_forward.3
= control target key start
LH: loop header
LB: loop body
LE: loop exit
PB: predicated region body
PF: predicated region fallthrough
CT: control target
= control target key end

     0   :  { %s1904_s25 = smov 0   ;;  %s1906_s26 = smov 0   ;;  %s2184_s0 = inlined_call_operand.vmem [shape: f32[20,4], index: 0, kind: input, shape index: {}]   ;;  %s2185_s1 = inlined_call_operand.vmem [shape: bf16[4,128], index: 1, kind: input, shape index: {}]   ;;  %s2186_s2 = inlined_call_operand.vmem [shape: f32[1,128], index: 2, kind: input, shape index: {}]   ;;  %s2187_s3 = inlined_call_operand.vmem [shape: bf16[128,128], index: 3, kind: input, shape index: {}]   ;;  %s2188_s4 = inlined_call_operand.vmem [shape: f32[1,128], index: 4, kind: input, shape index: {}]   ;;  %s2189_s5 = inlined_call_operand.vmem [shape: bf16[128,128], index: 5, kind: input, shape index: {}]   ;;  %s2190_s6 = inlined_call_operand.vmem [shape: f32[1,128], index: 6, kind: input, shape index: {}]   ;;  %s2191_s7 = inlined_call_operand.vmem [shape: bf16[128,128], index: 7, kind: input, shape index: {}]   ;;  %s2192_s8 = inlined_call_operand.vmem [shape: f32[1,128], index: 8, kind: input, shape index: {}]   ;;  %s2193_s9 = inlined_call_operand.vmem [shape: bf16[128,128], index: 9, kind: input, shape index: {}]   ;;  %s2194_s10 = inlined_call_operand.vmem [shape: f32[1,128], index: 10, kind: input, shape index: {}]   ;;  %s2195_s11 = inlined_call_operand.vmem [shape: bf16[128,128], index: 11, kind: input, shape index: {}]   ;;  %s2196_s12 = inlined_call_operand.vmem [shape: f32[1,128], index: 12, kind: input, shape index: {}]   ;;  %s2197_s13 = inlined_call_operand.vmem [shape: f32[20,4], index: 13, kind: output, shape index: {}]  }
   0x1   :  { %s1908_s27 = smov 0  }
   0x2 LB: > { %s1917_s28 = sadd.s32 4294967295, %s1798_s27   ;;  %s1919_s29 = sadd.s32 1, %s1798_s27   ;;  %s1798_s27 = sphi %s1908_s27, %s2201_s27   ;;  %s1794_s26 = sphi %s1906_s26, %s2200_s26   ;;  %s1790_s25 = sphi %s1904_s25, %s2199_s25  }
   0x3   : > { %s305_s30 = ssub.s32 %s1798_s27, %s1919_s29  ;;  %s308_s14 = sadd.s32 1, %s1794_s26 }
   0x4   : > { %p306_p0 = scmp.eq.s32.totalorder %s305_s30, 0  ;;  %p318_p1 = scmp.ne.s32.totalorder %s1794_s26, %s1790_s25 }
   0x5   : > { %p319_p2 = scmp.eq.s32.totalorder %s1917_s28, 1  ;;  %p1364_p3 = scmp.ge.s32.totalorder %s1798_s27, 1 }
   0x6   : > { %s1927_s15 = scalar_select %p306_p0, %s1794_s26, %s308_s14  }
   0x7   : > { %p1929_p4 = por %p319_p2, %p318_p1  ;;  %p396_p5 = scmp.lt.s32.totalorder %s1798_s27, 3 }
   0x9   : > { %p397_p6 = pnand %p1364_p3, %p396_p5 }
   0xa   : > { %v466_v0 = vld [vmem:[%s2185_s1] sm:$0x3] (!%p397_p6)  ;;  %vm478_vm0 = vcmask (!%p397_p6), 1041408   ;;  %s1937_s19 = sshll.u32 (!%p397_p6), %s1917_s28, 1  ;;  %v1832_v1 = vmov (!%p397_p6), 0.0   ;;  %vm1833_vm1 = vmmov (!%p397_p6), 0  }
   0xb   : > { %400 = sbr.rel (%p397_p6) target bundleno = 1475 (0x5c3), region = 72  ;;  %1484 = vmatprep.subr.bf16.mxu0 (!%p397_p6), %v1832_v1  ;;  %v480_v2 = vsel (!%p397_p6), %vm478_vm0, %v466_v0, 0  ;;  %1486 = vmatprep.mubr.msk.bf16.mxu0 (!%p397_p6), %vm1833_vm1, %v1832_v1  ;;  %p448_p7 = scmp.lt.s32.totalorder (!%p397_p6), %s1937_s19, 2  ;;  %v1680_v3 = vld [vmem:[%s2187_s3] sm:$0xff] (!%p397_p6)   ;;  %v1681_v4 = vld [vmem:[%s2187_s3 + $0x8] sm:$0xff] (!%p397_p6)   ;;  %vm474_vm2 = vcmask (!%p397_p6), 31744  }
   0xc   : > { %1485 = vmatpush3.bf16.msra.mxu0 (!%p397_p6), %v480_v2  ;;  %1490 = vmatprep.subr.bf16.mxu1 (!%p397_p6), %v1832_v1  ;;  %v1682_v8 = vld [vmem:[%s2187_s3 + $0x10] sm:$0xff] (!%p397_p6)   ;;  %v1683_v9 = vld [vmem:[%s2187_s3 + $0x18] sm:$0xff] (!%p397_p6)   ;;  %v1684_v10 = vld [vmem:[%s2187_s3 + $0x20] sm:$0xff] (!%p397_p6)   ;;  %s440_s14 = sand.u32 (!%p397_p6), 1, %s1790_s25  }
   0xd   : > { %1491 = vmatpush3.bf16.msra.mxu1 (!%p397_p6), %v1680_v3  ;;  %1506 = vmatprep.mubr.msk.bf16.mxu1 (!%p397_p6), %vm1833_vm1, %v1832_v1  ;;  %v1685_v11 = vld [vmem:[%s2187_s3 + $0x28] sm:$0xff] (!%p397_p6)   ;;  %v1686_v12 = vld [vmem:[%s2187_s3 + $0x30] sm:$0xff] (!%p397_p6)   ;;  %v1687_v13 = vld [vmem:[%s2187_s3 + $0x38] sm:$0xff] (!%p397_p6)  }
   0xe   : > { %1492 = vmatprep.subr.bf16.mxu1 (!%p397_p6), %v1832_v1  ;;  %1510 = vmatprep.subr.bf16.mxu0 (!%p397_p6), %v1832_v1  ;;  %v1688_v14 = vld [vmem:[%s2189_s5] sm:$0xff] (!%p397_p6)   ;;  %v1689_v15 = vld [vmem:[%s2189_s5 + $0x8] sm:$0xff] (!%p397_p6)   ;;  %v1690_v34 = vld [vmem:[%s2189_s5 + $0x10] sm:$0xff] (!%p397_p6)  }
   0xf   : > { %v1368_v16 = vld [vmem:[%s2186_s2] ss:$0 sm:$0xff] (!%p397_p6)  ;;  %v1691_v35 = vld [vmem:[%s2189_s5 + $0x18] sm:$0xff] (!%p397_p6)   ;;  %v1693_v37 = vld [vmem:[%s2189_s5 + $0x28] sm:$0xff] (!%p397_p6)  }
  0x10   : > { %v1692_v36 = vld [vmem:[%s2189_s5 + $0x20] sm:$0xff] (!%p397_p6)   ;;  %v1694_v38 = vld [vmem:[%s2189_s5 + $0x30] sm:$0xff] (!%p397_p6)   ;;  %v1695_v39 = vld [vmem:[%s2189_s5 + $0x38] sm:$0xff] (!%p397_p6)  }
  0x11   : > { %1493 = vmatpush3.bf16.msra.mxu1 (!%p397_p6), %v1681_v4  ;;  %v1696_v40 = vld [vmem:[%s2191_s7] sm:$0xff] (!%p397_p6)   ;;  %v1697_v41 = vld [vmem:[%s2191_s7 + $0x8] sm:$0xff] (!%p397_p6)   ;;  %v1698_v42 = vld [vmem:[%s2191_s7 + $0x10] sm:$0xff] (!%p397_p6)  }
  0x12   : > { %s449_s22 = scalar_select %p448_p7, %s1937_s19, 2  ;;  %1494 = vmatprep.subr.bf16.mxu1 %v1832_v1  ;;  %v1699_v43 = vld [vmem:[%s2191_s7 + $0x18] sm:$0xff]   ;;  %v1700_v44 = vld [vmem:[%s2191_s7 + $0x20] sm:$0xff]   ;;  %v1701_v45 = vld [vmem:[%s2191_s7 + $0x28] sm:$0xff]  }
  0x13   : > { %v1370_v46 = vld [vmem:[%s2188_s4] ss:$0 sm:$0xff]  ;;  %v1702_v0 = vld [vmem:[%s2191_s7 + $0x30] sm:$0xff]   ;;  %v1703_v2 = vld [vmem:[%s2191_s7 + $0x38] sm:$0xff]   ;;  %s1150_s20 = ssub.s32 (%p1929_p4), 3, %s1937_s19  ;;  %s1434_s21 = sshll.u32 (%p1929_p4), %s1917_s28, 4 }
  0x14   : > { %s1367_s27 = sshll.u32 %s449_s22, 3  ;;  %v1704_v3 = vld [vmem:[%s2193_s9] sm:$0xff]   ;;  %v1705_v4 = vld [vmem:[%s2193_s9 + $0x8] sm:$0xff]   ;;  %p1151_p8 = scmp.lt.s32.totalorder (%p1929_p4), %s1150_s20, 2 }
  0x15   : > { %s451_s17 = scalar_lea.vmem %s2184_s0, %s1367_s27  ;;  %1495 = vmatpush3.bf16.msra.mxu1 %v1682_v8  ;;  %s2150_s23 = scalar_lea.vmem (%p1929_p4), %s2197_s13, %s1434_s21  }
  0x16   : > { %v463_v5 = vld [vmem:[%s451_s17] sm:$0xff]  ;;  %v464_v6 = vld [vmem:[%s451_s17 + $0x8] sm:$0xff]  ;;  %1496 = vmatprep.subr.bf16.mxu1 %v1832_v1  ;;  %s1365_s17 = sshll.u32 %s440_s14, 4 }
  0x17   : > { %v465_v7 = vpack.c.bf16 %v464_v6, %v463_v5  ;;  %v1379_v5 = vld [vmem:[%s2190_s6] ss:$0 sm:$0xff]  ;;  %s2137_s18 = scalar_lea.vmem [#allocation2], %s1365_s17  }
  0x19   : > { %1487 = vmatmul.mubr.msk.bf16.vlgmr.msra.gmra.mrb[0].mxu0 %vm474_vm2, %v465_v7  ;;  %1497 = vmatpush3.bf16.msra.mxu1 %v1683_v9 }
  0x1a   : > { %1526 = vmatprep.mubr.msk.bf16.mxu0 %vm1833_vm1, %v1832_v1  ;;  %1498 = vmatprep.subr.bf16.mxu1 %v1832_v1 }
  0x1b   : > { %1511 = vmatpush3.bf16.msra.mxu0 %v1688_v14  ;;  %v1707_v14 = vld [vmem:[%s2193_s9 + $0x18] sm:$0xff]  }
  0x1c   : > { %1512 = vmatprep.subr.bf16.mxu0 %v1832_v1 }
  0x1d   : > { %1499 = vmatpush3.bf16.msra.mxu1 %v1684_v10 }
  0x1e   : > { %1500 = vmatprep.subr.bf16.mxu1 %v1832_v1 }
  0x1f   : > { %1513 = vmatpush3.bf16.msra.mxu0 %v1689_v15  ;;  %v1708_v15 = vld [vmem:[%s2193_s9 + $0x20] sm:$0xff]  }
  0x20   : > { %1514 = vmatprep.subr.bf16.mxu0 %v1832_v1 }
  0x21   : > { %1501 = vmatpush3.bf16.msra.mxu1 %v1685_v11 }
  0x22   : > { %1502 = vmatprep.subr.bf16.mxu1 %v1832_v1 }
  0x23   : > { %1515 = vmatpush3.bf16.msra.mxu0 %v1690_v34 }
  0x24   : > { %1516 = vmatprep.subr.bf16.mxu0 %v1832_v1 }
  0x25   : > { %1503 = vmatpush3.bf16.msra.mxu1 %v1686_v12 }
  0x26   : > { %1504 = vmatprep.subr.bf16.mxu1 %v1832_v1 }
  0x27   : > { %1517 = vmatpush3.bf16.msra.mxu0 %v1691_v35 }
  0x28   : > { %1518 = vmatprep.subr.bf16.mxu0 %v1832_v1 }
  0x29   : > { %1505 = vmatpush3.bf16.msra.mxu1 %v1687_v13  ;;  %v1706_v13 = vld [vmem:[%s2193_s9 + $0x10] sm:$0xff]  }
  0x2a   : > { %1530 = vmatprep.subr.bf16.mxu1 %v1832_v1 }
  0x2b   : > { %1519 = vmatpush3.bf16.msra.mxu0 %v1692_v36 }
  0x2c   : > { %1520 = vmatprep.subr.bf16.mxu0 %v1832_v1 }
  0x2f   : > { %1521 = vmatpush3.bf16.msra.mxu0 %v1693_v37 }
  0x30   : > { %1522 = vmatprep.subr.bf16.mxu0 %v1832_v1 }
  0x33   : > { %1523 = vmatpush3.bf16.msra.mxu0 %v1694_v38 }
  0x34   : > { %1524 = vmatprep.subr.bf16.mxu0 %v1832_v1 }
  0x37   : > { %1525 = vmatpush3.bf16.msra.mxu0 %v1695_v39  ;;  %v1714_v39 = vld [vmem:[%s2195_s11 + $0x10] sm:$0xff]  }
  0x38   : > { %1550 = vmatprep.subr.bf16.mxu0 %v1832_v1 }
  0xec   : > { %v516_v17 = vpop.f32.mrb[0].mxu0 }
  0xed   : > { %v517_v18 = vadd.f32 %v1368_v16, %v516_v17  ;;  %v1488_v19 = vpop.f32.mrb[1].mxu0  ;;  %v1710_v17 = vld [vmem:[%s2193_s9 + $0x30] sm:$0xff]  }
  0xee   : > { %v519_v20 = vpop.f32.mrb[2].mxu0  ;;  %v1712_v19 = vld [vmem:[%s2195_s11] sm:$0xff]  }
  0xef   : > { %v525_v21 = vmul.f32 0.70710677, %v517_v18  ;;  %v520_v22 = vadd.f32 %v1368_v16, %v519_v20  ;;  %v1489_v23 = vpop.f32.mrb[3].mxu0  ;;  %v523_v28 = vmul.f32 0.5, %v517_v18  ;;  %v1709_v16 = vld [vmem:[%s2193_s9 + $0x28] sm:$0xff]   ;;  %v1711_v18 = vld [vmem:[%s2193_s9 + $0x38] sm:$0xff]  }
  0xf0   : > { %v1713_v20 = vld [vmem:[%s2195_s11 + $0x8] sm:$0xff]  }
  0xf1   : > { %1720 = verf.f32 %v525_v21  ;;  %v526_v24 = vmul.f32 0.70710677, %v520_v22  ;;  %v524_v29 = vmul.f32 0.5, %v520_v22  ;;  %v1388_v21 = vld [vmem:[%s2192_s8] ss:$0 sm:$0xff] }
  0xf3   : > { %1722 = verf.f32 %v526_v24 }
  0xfb   : > { %v1721_v25 = vpop.eup %1720 }
  0xfc   : > { %v529_v26 = vadd.f32 1.0, %v1721_v25 }
  0xfd   : > { %v1723_v27 = vpop.eup %1722 }
  0xfe   : > { %v530_v30 = vadd.f32 1.0, %v1723_v27  ;;  %v531_v31 = vmul.f32 %v529_v26, %v523_v28 }
 0x100   : > { %v532_v32 = vmul.f32 %v530_v30, %v524_v29 }
 0x102   : > { %v533_v33 = vpack.c.bf16 %v532_v32, %v531_v31 }
 0x104   : > { %1507 = vmatmul.mubr.bf16.vlgmr.msra.gmra.mrb[0].mxu1 %v533_v33 }
 0x105   : > { %1546 = vmatprep.mubr.msk.bf16.mxu1 %vm1833_vm1, %v1832_v1  ;;  %1531 = vmatpush3.bf16.msra.mxu1 %v1696_v40  ;;  %v1715_v40 = vld [vmem:[%s2195_s11 + $0x18] sm:$0xff]  }
 0x106   : > { %1532 = vmatprep.subr.bf16.mxu1 %v1832_v1 }
 0x109   : > { %1533 = vmatpush3.bf16.msra.mxu1 %v1697_v41  ;;  %v1716_v41 = vld [vmem:[%s2195_s11 + $0x20] sm:$0xff]  }
 0x10a   : > { %1534 = vmatprep.subr.bf16.mxu1 %v1832_v1 }
 0x10d   : > { %1535 = vmatpush3.bf16.msra.mxu1 %v1698_v42  ;;  %v1717_v42 = vld [vmem:[%s2195_s11 + $0x28] sm:$0xff]  }
 0x10e   : > { %1536 = vmatprep.subr.bf16.mxu1 %v1832_v1 }
 0x111   : > { %1537 = vmatpush3.bf16.msra.mxu1 %v1699_v43  ;;  %v1718_v43 = vld [vmem:[%s2195_s11 + $0x30] sm:$0xff]  }
 0x112   : > { %1538 = vmatprep.subr.bf16.mxu1 %v1832_v1 }
 0x115   : > { %1539 = vmatpush3.bf16.msra.mxu1 %v1700_v44  ;;  %v1719_v44 = vld [vmem:[%s2195_s11 + $0x38] sm:$0xff]  }
 0x116   : > { %1540 = vmatprep.subr.bf16.mxu1 %v1832_v1 }
 0x119   : > { %1541 = vmatpush3.bf16.msra.mxu1 %v1701_v45  ;;  %v1397_v45 = vld [vmem:[%s2194_s10] ss:$0 sm:$0xff] }
 0x11a   : > { %1542 = vmatprep.subr.bf16.mxu1 %v1832_v1 }
 0x11d   : > { %1543 = vmatpush3.bf16.msra.mxu1 %v1702_v0 }
 0x11e   : > { %1544 = vmatprep.subr.bf16.mxu1 %v1832_v1 }
 0x121   : > { %1545 = vmatpush3.bf16.msra.mxu1 %v1703_v2 }
 0x122   : > { %1570 = vmatprep.subr.bf16.mxu1 %v1832_v1 }
 0x1d7   : > { %v639_v47 = vpop.f32.mrb[0].mxu1 }
 0x1d8   : > { %v640_v48 = vadd.f32 %v1370_v46, %v639_v47  ;;  %v1508_v49 = vpop.f32.mrb[1].mxu1 }
 0x1d9   : > { %v642_v50 = vpop.f32.mrb[2].mxu1 }
 0x1da   : > { %v648_v51 = vmul.f32 0.70710677, %v640_v48  ;;  %v643_v52 = vadd.f32 %v1370_v46, %v642_v50  ;;  %v1509_v53 = vpop.f32.mrb[3].mxu1  ;;  %v646_v58 = vmul.f32 0.5, %v640_v48 }
 0x1dc   : > { %1724 = verf.f32 %v648_v51  ;;  %v649_v54 = vmul.f32 0.70710677, %v643_v52  ;;  %v647_v59 = vmul.f32 0.5, %v643_v52 }
 0x1de   : > { %1726 = verf.f32 %v649_v54 }
 0x1e6   : > { %v1725_v55 = vpop.eup %1724 }
 0x1e7   : > { %v652_v56 = vadd.f32 1.0, %v1725_v55 }
 0x1e8   : > { %v1727_v57 = vpop.eup %1726 }
 0x1e9   : > { %v653_v60 = vadd.f32 1.0, %v1727_v57  ;;  %v654_v61 = vmul.f32 %v652_v56, %v646_v58 }
 0x1eb   : > { %v655_v62 = vmul.f32 %v653_v60, %v647_v59 }
 0x1ed   : > { %v656_v63 = vpack.c.bf16 %v655_v62, %v654_v61  ;;  %v1406_v62 = vld [vmem:[%s2196_s12] ss:$0 sm:$0xff] }
 0x1ef   : > { %1527 = vmatmul.mubr.bf16.vlgmr.msra.gmra.mrb[4].mxu0 %v656_v63 }
 0x1f0   : > { %1566 = vmatprep.mubr.msk.bf16.mxu0 %vm1833_vm1, %v1832_v1  ;;  %1551 = vmatpush3.bf16.msra.mxu0 %v1704_v3 }
 0x1f1   : > { %1552 = vmatprep.subr.bf16.mxu0 %v1832_v1 }
 0x1f4   : > { %1553 = vmatpush3.bf16.msra.mxu0 %v1705_v4 }
 0x1f5   : > { %1554 = vmatprep.subr.bf16.mxu0 %v1832_v1 }
 0x1f8   : > { %1555 = vmatpush3.bf16.msra.mxu0 %v1706_v13 }
 0x1f9   : > { %1556 = vmatprep.subr.bf16.mxu0 %v1832_v1 }
 0x1fc   : > { %1557 = vmatpush3.bf16.msra.mxu0 %v1707_v14 }
 0x1fd   : > { %1558 = vmatprep.subr.bf16.mxu0 %v1832_v1 }
 0x200   : > { %1559 = vmatpush3.bf16.msra.mxu0 %v1708_v15 }
 0x201   : > { %1560 = vmatprep.subr.bf16.mxu0 %v1832_v1 }
 0x204   : > { %1561 = vmatpush3.bf16.msra.mxu0 %v1709_v16 }
 0x205   : > { %1562 = vmatprep.subr.bf16.mxu0 %v1832_v1 }
 0x208   : > { %1563 = vmatpush3.bf16.msra.mxu0 %v1710_v17 }
 0x209   : > { %1564 = vmatprep.subr.bf16.mxu0 %v1832_v1 }
 0x20c   : > { %1565 = vmatpush3.bf16.msra.mxu0 %v1711_v18 }
 0x2c2   : > { %v762_v6 = vpop.f32.mrb[4].mxu0 }
 0x2c3   : > { %v1528_v7 = vpop.f32.mrb[5].mxu0  ;;  %v763_v9 = vadd.f32 %v1379_v5, %v762_v6 }
 0x2c4   : > { %v765_v8 = vpop.f32.mrb[6].mxu0 }
 0x2c5   : > { %v766_v10 = vadd.f32 %v1379_v5, %v765_v8  ;;  %v1529_v11 = vpop.f32.mrb[7].mxu0 }
 0x2c7   : > { %v769_v12 = vpack.c.bf16 %v766_v10, %v763_v9 }
 0x2c9   : > { %1547 = vmatmul.mubr.bf16.vlgmr.msra.gmra.mrb[4].mxu1 %v769_v12 }
 0x2ca   : > { %1586 = vmatprep.mubr.msk.bf16.mxu1 %vm1833_vm1, %v1832_v1  ;;  %1571 = vmatpush3.bf16.msra.mxu1 %v1712_v19 }
 0x2cb   : > { %1572 = vmatprep.subr.bf16.mxu1 %v1832_v1 }
 0x2ce   : > { %1573 = vmatpush3.bf16.msra.mxu1 %v1713_v20 }
 0x2cf   : > { %1574 = vmatprep.subr.bf16.mxu1 %v1832_v1 }
 0x2d2   : > { %1575 = vmatpush3.bf16.msra.mxu1 %v1714_v39 }
 0x2d3   : > { %1576 = vmatprep.subr.bf16.mxu1 %v1832_v1 }
 0x2d6   : > { %1577 = vmatpush3.bf16.msra.mxu1 %v1715_v40 }
 0x2d7   : > { %1578 = vmatprep.subr.bf16.mxu1 %v1832_v1 }
 0x2da   : > { %1579 = vmatpush3.bf16.msra.mxu1 %v1716_v41 }
 0x2db   : > { %1580 = vmatprep.subr.bf16.mxu1 %v1832_v1 }
 0x2de   : > { %1581 = vmatpush3.bf16.msra.mxu1 %v1717_v42 }
 0x2df   : > { %1582 = vmatprep.subr.bf16.mxu1 %v1832_v1 }
 0x2e2   : > { %1583 = vmatpush3.bf16.msra.mxu1 %v1718_v43 }
 0x2e3   : > { %1584 = vmatprep.subr.bf16.mxu1 %v1832_v1 }
 0x2e6   : > { %1585 = vmatpush3.bf16.msra.mxu1 %v1719_v44 }
 0x39c   : > { %v875_v22 = vpop.f32.mrb[4].mxu1 }
 0x39d   : > { %v876_v23 = vadd.f32 %v1388_v21, %v875_v22  ;;  %v1548_v24 = vpop.f32.mrb[5].mxu1 }
 0x39e   : > { %v878_v25 = vpop.f32.mrb[6].mxu1 }
 0x39f   : > { %v884_v26 = vmul.f32 0.70710677, %v876_v23  ;;  %v879_v27 = vadd.f32 %v1388_v21, %v878_v25  ;;  %v1549_v28 = vpop.f32.mrb[7].mxu1  ;;  %v882_v33 = vmul.f32 0.5, %v876_v23 }
 0x3a1   : > { %1728 = verf.f32 %v884_v26  ;;  %v885_v29 = vmul.f32 0.70710677, %v879_v27  ;;  %v883_v34 = vmul.f32 0.5, %v879_v27 }
 0x3a3   : > { %1730 = verf.f32 %v885_v29 }
 0x3ab   : > { %v1729_v30 = vpop.eup %1728 }
 0x3ac   : > { %v888_v31 = vadd.f32 1.0, %v1729_v30 }
 0x3ad   : > { %v1731_v32 = vpop.eup %1730 }
 0x3ae   : > { %v889_v35 = vadd.f32 1.0, %v1731_v32  ;;  %v890_v36 = vmul.f32 %v888_v31, %v882_v33 }
 0x3b0   : > { %v891_v37 = vmul.f32 %v889_v35, %v883_v34 }
 0x3b2   : > { %v892_v38 = vpack.c.bf16 %v891_v37, %v890_v36 }
 0x3b4   : > { %1567 = vmatmul.mubr.bf16.vlgmr.msra.gmra.mrb[8].mxu0 %v892_v38 }
 0x487   : > { %v998_v46 = vpop.f32.mrb[8].mxu0 }
 0x488   : > { %v999_v47 = vadd.f32 %v1397_v45, %v998_v46  ;;  %v1568_v48 = vpop.f32.mrb[9].mxu0 }
 0x489   : > { %v1001_v49 = vpop.f32.mrb[10].mxu0 }
 0x48a   : > { %v1007_v50 = vmul.f32 0.70710677, %v999_v47  ;;  %v1002_v51 = vadd.f32 %v1397_v45, %v1001_v49  ;;  %v1569_v52 = vpop.f32.mrb[11].mxu0  ;;  %v1005_v56 = vmul.f32 0.5, %v999_v47 }
 0x48c   : > { %1732 = verf.f32 %v1007_v50  ;;  %v1008_v53 = vmul.f32 0.70710677, %v1002_v51  ;;  %v1006_v57 = vmul.f32 0.5, %v1002_v51 }
 0x48e   : > { %1734 = verf.f32 %v1008_v53 }
 0x496   : > { %v1733_v1 = vpop.eup %1732 }
 0x497   : > { %v1011_v54 = vadd.f32 1.0, %v1733_v1 }
 0x498   : > { %v1735_v55 = vpop.eup %1734 }
 0x499   : > { %v1012_v58 = vadd.f32 1.0, %v1735_v55  ;;  %v1013_v59 = vmul.f32 %v1011_v54, %v1005_v56 }
 0x49b   : > { %v1014_v60 = vmul.f32 %v1012_v58, %v1006_v57 }
 0x49d   : > { %v1015_v61 = vpack.c.bf16 %v1014_v60, %v1013_v59 }
 0x49f   : > { %1587 = vmatmul.mubr.bf16.vlgmr.msra.gmra.mrb[8].mxu1 %v1015_v61 }
 0x572   : > { %v1121_v63 = vpop.f32.mrb[8].mxu1 }
 0x573   : > { %v1122_v0 = vadd.f32 %v1406_v62, %v1121_v63  ;;  %v1588_v2 = vpop.f32.mrb[9].mxu1 }
 0x574   : > { %v1124_v3 = vpop.f32.mrb[10].mxu1 }
 0x575   : > { %v1415_v4 = vmul.f32 -1.442695, %v1122_v0  ;;  %v1125_v5 = vadd.f32 %v1406_v62, %v1124_v3  ;;  %v1589_v6 = vpop.f32.mrb[11].mxu1 }
 0x577   : > { %1736 = vpow2.f32 %v1415_v4  ;;  %v1416_v7 = vmul.f32 -1.442695, %v1125_v5 }
 0x579   : > { %1738 = vpow2.f32 %v1416_v7 }
 0x581   : > { %v1737_v8 = vpop.eup %1736 }
 0x582   : > { %v1134_v9 = vadd.f32 1.0, %v1737_v8 }
 0x583   : > { %v1739_v10 = vpop.eup %1738 }
 0x584   : > { %1740 = vrcp.f32 %v1134_v9  ;;  %v1135_v11 = vadd.f32 1.0, %v1739_v10 }
 0x586   : > { %1742 = vrcp.f32 %v1135_v11 }
 0x58b   : > { %1148 = sbr.rel (!%p1929_p4) target bundleno = 1475 (0x5c3), region = 76 }
 0x58e   : > { %v1741_v12 = vpop.eup %1740 }
 0x58f   : > { %1140 = vst.msk [vmem:[%s2137_s18] sm:$0xff] %vm474_vm2, %v1741_v12 }
 0x590   : > { %v1743_v13 = vpop.eup %1742 }
 0x591   : > { %1141 = vst.msk [vmem:[%s2137_s18 + $0x8] sm:$0xff] %vm474_vm2, %v1743_v13 }
 0x592   : > { %s2203_s20 = smov (!%p1151_p8, %s1150_s20), 2 }
 0x593   : > { %s1419_s24 = sshll.u32 %s2203_s20, 7 }
 0x594   : > { %p1422_p9 = scmp.eq.s32.totalorder %s1419_s24, 0 }
 0x595   : > { %s2156_s27 = sshrl.u32 (!%p1422_p9), %s2203_s20, 1 }
 0x596   : > { %1159 = sbr.rel (%p1422_p9) target bundleno = 1475 (0x5c3), region = 80  ;;  %p1423_p10 = scmp.le.s32.totalorder (!%p1422_p9), %s2156_s27, 0 }
 0x59d   : > { %1317 = sbr.rel (%p1423_p10) target bundleno = 1454 (0x5ae), region = 156  ;;  %s1800_s28 = smov (!%p1423_p10), %s2150_s23  }
 0x59e   : > { %s1804_s16 = smov (!%p1423_p10), %s2137_s18   ;;  %s1808_s19 = smov (!%p1423_p10), 0  }
 0x59f   : > { %s1812_s30 = smov (!%p1423_p10), 0  }
 0x5a4 LB: >> { %v1223_v14 = vld [vmem:[%s1806_s16] sm:$0xff]  ;;  %v1225_v15 = vld [vmem:[%s1806_s16 + $0x8] sm:$0xff]  ;;  %s1227_s14 = sadd.s32 1, %s1810_s19  ;;  %s1217_s30 = sadd.s32 1, %s1814_s30   ;;  %s1814_s30 = sphi %s1812_s30, %s1217_s30   ;;  %s1810_s19 = sphi %s1808_s19, %s1809_s19   ;;  %s1806_s16 = sphi %s1804_s16, %s1232_s16   ;;  %s1802_s28 = sphi %s1800_s28, %s1233_s28  }
 0x5a5   : >> { %1224 = vst [vmem:[%s1802_s28] sm:$0xff] %v1223_v14  ;;  %1226 = vst [vmem:[%s1802_s28 + $0x8] sm:$0xff] %v1225_v15  ;;  %p1228_p11 = scmp.ge.s32.totalorder %s1227_s14, %s2156_s27  ;;  %p1216_p12 = scmp.ge.s32.totalorder %s1217_s30, %s2156_s27 }
 0x5a7   : >> { %s2205_s14 = smov (%p1228_p11, %s1227_s14), 0  ;;  %1219 = sbr.rel (!%p1216_p12) target bundleno = 1444 (0x5a4), region = 162 }
 0x5a8   : >> { %s1424_s17 = sshll.u32 %s2205_s14, 4  ;;  %s1809_s19 = smov %s2205_s14  }
 0x5a9   : >> { %s1232_s16 = scalar_lea.vmem %s2137_s18, %s1424_s17 [#allocation2]   ;;  %s1233_s28 = scalar_lea.vmem %s2150_s23, %s1424_s17  }
 0x5ae PF: > { %s2166_s21 = sand.u32 1, %s2203_s20   ;;  %s1435_s25 = sshll.u32 %s2156_s27, 4 }
 0x5af   : > { %s1238_s22 = scalar_lea.vmem %s2137_s18, %s1435_s25 [#allocation2]   ;;  %s1240_s24 = scalar_lea.vmem %s2150_s23, %s1435_s25  }
 0x5b0   : > { %p1429_p13 = scmp.le.s32.totalorder %s2166_s21, 0 }
 0x5b1   : > { %s1816_s19 = smov (!%p1429_p13), %s1240_s24   ;;  %s1820_s17 = smov (!%p1429_p13), %s1238_s22  }
 0x5b2   : > { %1331 = sbr.rel (%p1429_p13) target bundleno = 1475 (0x5c3), region = 167  ;;  %s1824_s28 = smov (!%p1429_p13), 0  }
 0x5b3   : > { %s1828_s16 = smov (!%p1429_p13), 0  }
 0x5b9 LB: >> { %v1250_v16 = vld [vmem:[%s1822_s17] sm:$0xff]  ;;  %s1252_s20 = sadd.s32 1, %s1826_s28  ;;  %s1244_s16 = sadd.s32 1, %s1830_s16   ;;  %s1830_s16 = sphi %s1828_s16, %s1244_s16   ;;  %s1826_s28 = sphi %s1824_s28, %s1825_s28   ;;  %s1822_s17 = sphi %s1820_s17, %s1257_s17   ;;  %s1818_s19 = sphi %s1816_s19, %s1258_s19  }
 0x5ba   : >> { %1251 = vst [vmem:[%s1818_s19] sm:$0xff] %v1250_v16  ;;  %p1253_p0 = scmp.ge.s32.totalorder %s1252_s20, %s2166_s21  ;;  %p1243_p1 = scmp.ge.s32.totalorder %s1244_s16, %s2166_s21 }
 0x5bc   : >> { %s2207_s20 = smov (%p1253_p0, %s1252_s20), 0  ;;  %1246 = sbr.rel (!%p1243_p1) target bundleno = 1465 (0x5b9), region = 173 }
 0x5bd   : >> { %s1430_s18 = sshll.u32 %s2207_s20, 3  ;;  %s1825_s28 = smov %s2207_s20  }
 0x5be   : >> { %s1257_s17 = scalar_lea.vmem %s1238_s22, %s1430_s18 [#allocation2]   ;;  %s1258_s19 = scalar_lea.vmem %s1240_s24, %s1430_s18  }
 0x5c3 PF: > { %p20_p2 = scmp.ge.s32.totalorder %s1919_s29, 4   ;;  %s2199_s25 = smov %s1794_s26 }
 0x5c4   : > { %s2200_s26 = smov %s1927_s15  ;;  %s2201_s27 = smov %s1919_s29 }
 0x5c5   :  { %22 = sbr.rel (!%p20_p2) target bundleno = 2 (0x2), region = 184 }

</bundles_post_ra>
